<compile_context>
chip_gen: v7x
topology: tpu7x:2x2x1
jax: 0.10.0
libtpu: 0.0.40
codegen_flags: <defaults>
</compile_context>

<pallas_src>
import jax
import jax.numpy as jnp
from jax import lax
from jax.experimental import pallas as pl
from jax.experimental.pallas import tpu as pltpu


# ------------------------------ kernels ------------------------------

def _conv_relu_pool_kernel(x_ref, sel_ref, wb_ref, b_ref, o_ref):
    """Fused Conv2d(3x3, pad=1) + bias + ReLU + MaxPool2d(2,2) for one image.

    x_ref  : (1, H+2, (W+2)*Cin)          bf16  zero-padded NHWC image, (w, c) folded into lanes
    sel_ref: (4, Hp, H+2)                 bf16  row-selection matrices (rows s, s+2, s+4, ...)
    wb_ref : (2, 3, (W+2)*Cin, Wp*Cout)   bf16  banded conv weights per (pool-dx, kh)
    b_ref  : (1, Wp*Cout)                 f32   conv bias tiled over pooled-width lanes
    o_ref  : (1, Hp, Wp*Cout)             bf16  pooled activations, NHWC order, lane-dense
    """
    x = x_ref[0]                                              # (H+2, (W+2)*Cin)

    # Row gathers as tiny matmuls (exact 0/1 selection, no rounding, MXU has slack).
    xs = [jnp.dot(sel_ref[s], x,
                  preferred_element_type=jnp.float32).astype(jnp.bfloat16)
          for s in range(4)]                                  # each (Hp, (W+2)*Cin)

    pooled = None
    for dy in range(2):          # pooling-window row offset
        for dx in range(2):      # pooling-window col offset
            acc = jnp.dot(xs[dy], wb_ref[dx, 0], preferred_element_type=jnp.float32)
            acc = acc + jnp.dot(xs[dy + 1], wb_ref[dx, 1], preferred_element_type=jnp.float32)
            acc = acc + jnp.dot(xs[dy + 2], wb_ref[dx, 2], preferred_element_type=jnp.float32)
            pooled = acc if pooled is None else jnp.maximum(pooled, acc)

    # bias add + ReLU commute with the max over the four pooling-window corners
    o_ref[0] = jnp.maximum(pooled + b_ref[...], 0.0).astype(o_ref.dtype)


def _mlp_kernel(p_ref, w1_ref, b1_ref, w2_ref, b2_ref, o_ref, acc_ref):
    """Linear(F,HID) + ReLU + Linear(HID,J); the F reduction is tiled over the grid."""
    k = pl.program_id(0)

    @pl.when(k == 0)
    def _init():
        acc_ref[...] = jnp.zeros_like(acc_ref)

    acc_ref[...] += jnp.dot(p_ref[...], w1_ref[...], preferred_element_type=jnp.float32)

    @pl.when(k == pl.num_programs(0) - 1)
    def _finalize():
        h = jnp.maximum(acc_ref[...] + b1_ref[...], 0.0).astype(jnp.bfloat16)
        o_ref[...] = (jnp.dot(h, w2_ref[...], preferred_element_type=jnp.float32)
                      + b2_ref[...])


# ------------------------------ glue helpers ------------------------------

def _row_select_mats(H):
    """(4, Hp, H+2) 0/1 matrices; mat[s] @ X picks padded rows s, s+2, s+4, ..."""
    Hp = H // 2
    rows = jnp.arange(H + 2)
    ph = jnp.arange(Hp)
    return jnp.stack(
        [(rows[None, :] == (2 * ph[:, None] + s)).astype(jnp.bfloat16) for s in range(4)],
        axis=0)


def _banded_conv_weights(wc, W):
    """Torch conv weight (Cout,Cin,3,3) -> banded matrices (2, 3, (W+2)*Cin, Wp*Cout).

    B[dx, kh][(2*pw + dx + kw)*Cin + ci, pw*Cout + co] = wc[co, ci, kh, kw]
    so that  (padded row r of the image, flattened over (w, c)) @ B[dx, kh]
    yields the conv contribution of kernel row kh at all even/odd (dx) output columns.
    """
    Cout, Cin, KH, KW = wc.shape
    Wp = W // 2
    wk = jnp.transpose(wc, (2, 3, 1, 0))                       # (KH, KW, Cin, Cout)
    r = jnp.arange((W + 2) * Cin)
    col_pad, ci = r // Cin, r % Cin
    c = jnp.arange(Wp * Cout)
    pw, co = c // Cout, c % Cout

    def band(dx, kh):
        acc = jnp.zeros(((W + 2) * Cin, Wp * Cout), jnp.float32)
        for kw in range(KW):
            mask = col_pad[:, None] == (2 * pw + dx + kw)[None, :]
            vals = wk[kh, kw][ci[:, None], co[None, :]]
            acc = acc + jnp.where(mask, vals, 0.0)
        return acc

    return jnp.stack(
        [jnp.stack([band(dx, kh) for kh in range(KH)]) for dx in range(2)]
    ).astype(jnp.bfloat16)


def _pick_reduction_tile(F):
    # largest lane-aligned divisor of F that still gives >= 2 pipeline steps; keeps
    # each (tk, 512) bf16 w1 block (double-buffered) small vs scoped VMEM on v5e/v6e/v7x.
    for tk in (2048, 1024, 512, 256, 128):
        if F % tk == 0 and F // tk >= 2:
            return tk
    return F


# ------------------------------ forward ------------------------------

def visuomotor_forward(x_nchw, params):
    wc, bc, w1, b1, w2, b2 = (params[k] for k in ("wc", "bc", "w1", "b1", "w2", "b2"))
    N, Cin, H, W = x_nchw.shape
    Cout = wc.shape[0]
    assert H % 2 == 0 and W % 2 == 0, "MaxPool2d(2,2) path assumes even H, W"
    Hp, Wp = H // 2, W // 2
    F = Cout * Hp * Wp
    HID = w1.shape[0]
    J = w2.shape[0]

    # ---- glue: layout prep (weights only; no 9x im2col expansion of the image) ----
    xn = jnp.transpose(x_nchw, (0, 2, 3, 1))                      # NCHW -> NHWC
    xpad = jnp.pad(xn, ((0, 0), (1, 1), (1, 1), (0, 0)))
    x2 = xpad.reshape(N, H + 2, (W + 2) * Cin).astype(jnp.bfloat16)

    sel = _row_select_mats(H)                                     # (4, Hp, H+2)      bf16
    wb = _banded_conv_weights(wc, W)                              # (2,3,(W+2)Cin,WpCout) bf16
    b_row = jnp.tile(bc.astype(jnp.float32), Wp).reshape(1, Wp * Cout)

    # ---- stage 1: fused conv + bias + ReLU + 2x2 max-pool (grid over batch) ----
    pooled = pl.pallas_call(
        _conv_relu_pool_kernel,
        grid=(N,),
        in_specs=[
            pl.BlockSpec((1, H + 2, (W + 2) * Cin), lambda n: (n, 0, 0)),
            pl.BlockSpec((4, Hp, H + 2), lambda n: (0, 0, 0)),
            pl.BlockSpec((2, 3, (W + 2) * Cin, Wp * Cout), lambda n: (0, 0, 0, 0)),
            pl.BlockSpec((1, Wp * Cout), lambda n: (0, 0)),
        ],
        out_specs=pl.BlockSpec((1, Hp, Wp * Cout), lambda n: (n, 0, 0)),
        out_shape=jax.ShapeDtypeStruct((N, Hp, Wp * Cout), jnp.bfloat16),
        compiler_params=pltpu.CompilerParams(dimension_semantics=("parallel",)),
    )(x2, sel, wb, b_row)

    # NHWC flatten order (h, w, c); free metadata reshape.
    pooled2d = pooled.reshape(N, F)

    # linear1 weight expects torch NCHW flatten order (c, h, w) -> permute to (h, w, c)
    w1_mat = (jnp.transpose(w1.reshape(HID, Cout, Hp, Wp), (2, 3, 1, 0))
              .reshape(F, HID).astype(jnp.bfloat16))
    w2_mat = jnp.transpose(w2).astype(jnp.bfloat16)               # (HID, J)
    b1_row = b1.reshape(1, HID).astype(jnp.float32)
    b2_row = b2.reshape(1, J).astype(jnp.float32)

    # ---- stage 2: Linear -> ReLU -> Linear, F reduction tiled (weight streaming) ----
    tk = _pick_reduction_tile(F)
    out = pl.pallas_call(
        _mlp_kernel,
        grid=(F // tk,),
        in_specs=[
            pl.BlockSpec((N, tk), lambda k: (0, k)),
            pl.BlockSpec((tk, HID), lambda k: (k, 0)),
            pl.BlockSpec((1, HID), lambda k: (0, 0)),
            pl.BlockSpec((HID, J), lambda k: (0, 0)),
            pl.BlockSpec((1, J), lambda k: (0, 0)),
        ],
        out_specs=pl.BlockSpec((N, J), lambda k: (0, 0)),
        out_shape=jax.ShapeDtypeStruct((N, J), jnp.float32),
        scratch_shapes=[pltpu.VMEM((N, HID), jnp.float32)],
        compiler_params=pltpu.CompilerParams(dimension_semantics=("arbitrary",)),
    )(pooled2d, w1_mat, b1_row, w2_mat, b2_row)
    return out


# ---------------- pure-JAX reference (PyTorch semantics, f32) ----------------

def reference_forward(x_nchw, params):
    wc, bc, w1, b1, w2, b2 = (params[k] for k in ("wc", "bc", "w1", "b1", "w2", "b2"))
    y = lax.conv_general_dilated(
        x_nchw, wc, window_strides=(1, 1), padding=((1, 1), (1, 1)),
        dimension_numbers=("NCHW", "OIHW", "NCHW"))
    y = jax.nn.relu(y + bc.reshape(1, -1, 1, 1))
    y = lax.reduce_window(y, -jnp.inf, lax.max, (1, 1, 2, 2), (1, 1, 2, 2), "VALID")
    f = y.reshape(y.shape[0], -1)                 # NCHW flatten, like torch.flatten(x, 1)
    h = jax.nn.relu(f @ w1.T + b1)
    return h @ w2.T + b2


if __name__ == "__main__":
    N, Cin, H, W = 2, 3, 16, 16
    num_joints = 7
    Cout, HID = 16, 512
    F = Cout * (H // 2) * (W // 2)

    key = jax.random.PRNGKey(0)
    ks = jax.random.split(key, 7)
    x = jax.random.normal(ks[0], (N, Cin, H, W), jnp.float32)
    params = dict(
        wc=0.1 * jax.random.normal(ks[1], (Cout, Cin, 3, 3), jnp.float32),
        bc=0.1 * jax.random.normal(ks[2], (Cout,), jnp.float32),
        w1=0.02 * jax.random.normal(ks[3], (HID, F), jnp.float32),
        b1=0.02 * jax.random.normal(ks[4], (HID,), jnp.float32),
        w2=0.02 * jax.random.normal(ks[5], (num_joints, HID), jnp.float32),
        b2=0.02 * jax.random.normal(ks[6], (num_joints,), jnp.float32),
    )

    out = jax.block_until_ready(jax.jit(visuomotor_forward)(x, params))
    ref = jax.block_until_ready(reference_forward(x, params))

    assert out.shape == (N, num_joints), out.shape
    max_err = float(jnp.max(jnp.abs(out - ref)))
    # bf16 matmul operands (f32 accumulation) -> compare at bf16-appropriate tolerance
    assert jnp.allclose(out, ref, rtol=3e-2, atol=3e-2), max_err
    print("KERNEL_OK")
</pallas_src>

<mosaic_0001>
module attributes {stable_mosaic.version = 11 : i64} {
  func.func @_conv_relu_pool_kernel(%arg0: i32, %arg1: memref<1x18x54xbf16, #tpu.memory_space<vmem>>, %arg2: memref<4x8x18xbf16, #tpu.memory_space<vmem>>, %arg3: memref<2x3x54x128xbf16, #tpu.memory_space<vmem>>, %arg4: memref<1x128xf32, #tpu.memory_space<vmem>>, %arg5: memref<1x8x128xbf16, #tpu.memory_space<vmem>>) attributes {dimension_semantics = [#tpu.dimension_semantics<parallel>], iteration_bounds = array<i64: 2>, scalar_prefetch = 0 : i64, scratch_operands = 0 : i64, tpu.core_type = #tpu.core_type<tc>, window_params = [{transform_indices = @transform_0, window_bounds = array<i64: 1, 18, 54>}, {pipeline_mode = #tpu.pipeline_mode<synchronous>, transform_indices = @transform_1, window_bounds = array<i64: 4, 8, 18>}, {pipeline_mode = #tpu.pipeline_mode<synchronous>, transform_indices = @transform_2, window_bounds = array<i64: 2, 3, 54, 128>}, {pipeline_mode = #tpu.pipeline_mode<synchronous>, transform_indices = @transform_3, window_bounds = array<i64: 1, 128>}, {transform_indices = @transform_4, window_bounds = array<i64: 1, 8, 128>}]} {
    %c0 = arith.constant 0 : index
    %c0_0 = arith.constant 0 : index
    %c0_1 = arith.constant 0 : index
    %0 = vector.load %arg1[%c0, %c0_0, %c0_1] : memref<1x18x54xbf16, #tpu.memory_space<vmem>>, vector<1x18x54xbf16>
    %1 = vector.shape_cast %0 : vector<1x18x54xbf16> to vector<18x54xbf16>
    %c0_2 = arith.constant 0 : index
    %c0_3 = arith.constant 0 : index
    %c0_4 = arith.constant 0 : index
    %2 = vector.load %arg2[%c0_2, %c0_3, %c0_4] : memref<4x8x18xbf16, #tpu.memory_space<vmem>>, vector<1x8x18xbf16>
    %3 = vector.shape_cast %2 : vector<1x8x18xbf16> to vector<8x18xbf16>
    %cst = arith.constant dense<0.000000e+00> : vector<8x54xf32>
    %4 = tpu.matmul %3, %1, %cst {dimension_numbers = #tpu.dot_dimension_numbers<[1], [0], [0], [1], [0, 0, 1, 1], [], []>} : vector<8x18xbf16>, vector<18x54xbf16>, vector<8x54xf32> -> vector<8x54xf32>
    %5 = arith.truncf %4 : vector<8x54xf32> to vector<8x54xbf16>
    %c1 = arith.constant 1 : index
    %c0_5 = arith.constant 0 : index
    %c0_6 = arith.constant 0 : index
    %6 = vector.load %arg2[%c1, %c0_5, %c0_6] : memref<4x8x18xbf16, #tpu.memory_space<vmem>>, vector<1x8x18xbf16>
    %7 = vector.shape_cast %6 : vector<1x8x18xbf16> to vector<8x18xbf16>
    %cst_7 = arith.constant dense<0.000000e+00> : vector<8x54xf32>
    %8 = tpu.matmul %7, %1, %cst_7 {dimension_numbers = #tpu.dot_dimension_numbers<[1], [0], [0], [1], [0, 0, 1, 1], [], []>} : vector<8x18xbf16>, vector<18x54xbf16>, vector<8x54xf32> -> vector<8x54xf32>
    %9 = arith.truncf %8 : vector<8x54xf32> to vector<8x54xbf16>
    %c2 = arith.constant 2 : index
    %c0_8 = arith.constant 0 : index
    %c0_9 = arith.constant 0 : index
    %10 = vector.load %arg2[%c2, %c0_8, %c0_9] : memref<4x8x18xbf16, #tpu.memory_space<vmem>>, vector<1x8x18xbf16>
    %11 = vector.shape_cast %10 : vector<1x8x18xbf16> to vector<8x18xbf16>
    %cst_10 = arith.constant dense<0.000000e+00> : vector<8x54xf32>
    %12 = tpu.matmul %11, %1, %cst_10 {dimension_numbers = #tpu.dot_dimension_numbers<[1], [0], [0], [1], [0, 0, 1, 1], [], []>} : vector<8x18xbf16>, vector<18x54xbf16>, vector<8x54xf32> -> vector<8x54xf32>
    %13 = arith.truncf %12 : vector<8x54xf32> to vector<8x54xbf16>
    %c3 = arith.constant 3 : index
    %c0_11 = arith.constant 0 : index
    %c0_12 = arith.constant 0 : index
    %14 = vector.load %arg2[%c3, %c0_11, %c0_12] : memref<4x8x18xbf16, #tpu.memory_space<vmem>>, vector<1x8x18xbf16>
    %15 = vector.shape_cast %14 : vector<1x8x18xbf16> to vector<8x18xbf16>
    %cst_13 = arith.constant dense<0.000000e+00> : vector<8x54xf32>
    %16 = tpu.matmul %15, %1, %cst_13 {dimension_numbers = #tpu.dot_dimension_numbers<[1], [0], [0], [1], [0, 0, 1, 1], [], []>} : vector<8x18xbf16>, vector<18x54xbf16>, vector<8x54xf32> -> vector<8x54xf32>
    %17 = arith.truncf %16 : vector<8x54xf32> to vector<8x54xbf16>
    %c0_14 = arith.constant 0 : index
    %c0_15 = arith.constant 0 : index
    %c0_16 = arith.constant 0 : index
    %c0_17 = arith.constant 0 : index
    %18 = vector.load %arg3[%c0_14, %c0_15, %c0_16, %c0_17] : memref<2x3x54x128xbf16, #tpu.memory_space<vmem>>, vector<1x1x54x128xbf16>
    %19 = vector.shape_cast %18 : vector<1x1x54x128xbf16> to vector<54x128xbf16>
    %cst_18 = arith.constant dense<0.000000e+00> : vector<8x128xf32>
    %20 = tpu.matmul %5, %19, %cst_18 {dimension_numbers = #tpu.dot_dimension_numbers<[1], [0], [0], [1], [0, 0, 1, 1], [], []>} : vector<8x54xbf16>, vector<54x128xbf16>, vector<8x128xf32> -> vector<8x128xf32>
    %c0_19 = arith.constant 0 : index
    %c1_20 = arith.constant 1 : index
    %c0_21 = arith.constant 0 : index
    %c0_22 = arith.constant 0 : index
    %21 = vector.load %arg3[%c0_19, %c1_20, %c0_21, %c0_22] : memref<2x3x54x128xbf16, #tpu.memory_space<vmem>>, vector<1x1x54x128xbf16>
    %22 = vector.shape_cast %21 : vector<1x1x54x128xbf16> to vector<54x128xbf16>
    %cst_23 = arith.constant dense<0.000000e+00> : vector<8x128xf32>
    %23 = tpu.matmul %9, %22, %cst_23 {dimension_numbers = #tpu.dot_dimension_numbers<[1], [0], [0], [1], [0, 0, 1, 1], [], []>} : vector<8x54xbf16>, vector<54x128xbf16>, vector<8x128xf32> -> vector<8x128xf32>
    %24 = arith.addf %20, %23 : vector<8x128xf32>
    %c0_24 = arith.constant 0 : index
    %c2_25 = arith.constant 2 : index
    %c0_26 = arith.constant 0 : index
    %c0_27 = arith.constant 0 : index
    %25 = vector.load %arg3[%c0_24, %c2_25, %c0_26, %c0_27] : memref<2x3x54x128xbf16, #tpu.memory_space<vmem>>, vector<1x1x54x128xbf16>
    %26 = vector.shape_cast %25 : vector<1x1x54x128xbf16> to vector<54x128xbf16>
    %cst_28 = arith.constant dense<0.000000e+00> : vector<8x128xf32>
    %27 = tpu.matmul %13, %26, %cst_28 {dimension_numbers = #tpu.dot_dimension_numbers<[1], [0], [0], [1], [0, 0, 1, 1], [], []>} : vector<8x54xbf16>, vector<54x128xbf16>, vector<8x128xf32> -> vector<8x128xf32>
    %28 = arith.addf %24, %27 : vector<8x128xf32>
    %c1_29 = arith.constant 1 : index
    %c0_30 = arith.constant 0 : index
    %c0_31 = arith.constant 0 : index
    %c0_32 = arith.constant 0 : index
    %29 = vector.load %arg3[%c1_29, %c0_30, %c0_31, %c0_32] : memref<2x3x54x128xbf16, #tpu.memory_space<vmem>>, vector<1x1x54x128xbf16>
    %30 = vector.shape_cast %29 : vector<1x1x54x128xbf16> to vector<54x128xbf16>
    %cst_33 = arith.constant dense<0.000000e+00> : vector<8x128xf32>
    %31 = tpu.matmul %5, %30, %cst_33 {dimension_numbers = #tpu.dot_dimension_numbers<[1], [0], [0], [1], [0, 0, 1, 1], [], []>} : vector<8x54xbf16>, vector<54x128xbf16>, vector<8x128xf32> -> vector<8x128xf32>
    %c1_34 = arith.constant 1 : index
    %c1_35 = arith.constant 1 : index
    %c0_36 = arith.constant 0 : index
    %c0_37 = arith.constant 0 : index
    %32 = vector.load %arg3[%c1_34, %c1_35, %c0_36, %c0_37] : memref<2x3x54x128xbf16, #tpu.memory_space<vmem>>, vector<1x1x54x128xbf16>
    %33 = vector.shape_cast %32 : vector<1x1x54x128xbf16> to vector<54x128xbf16>
    %cst_38 = arith.constant dense<0.000000e+00> : vector<8x128xf32>
    %34 = tpu.matmul %9, %33, %cst_38 {dimension_numbers = #tpu.dot_dimension_numbers<[1], [0], [0], [1], [0, 0, 1, 1], [], []>} : vector<8x54xbf16>, vector<54x128xbf16>, vector<8x128xf32> -> vector<8x128xf32>
    %35 = arith.addf %31, %34 : vector<8x128xf32>
    %c1_39 = arith.constant 1 : index
    %c2_40 = arith.constant 2 : index
    %c0_41 = arith.constant 0 : index
    %c0_42 = arith.constant 0 : index
    %36 = vector.load %arg3[%c1_39, %c2_40, %c0_41, %c0_42] : memref<2x3x54x128xbf16, #tpu.memory_space<vmem>>, vector<1x1x54x128xbf16>
    %37 = vector.shape_cast %36 : vector<1x1x54x128xbf16> to vector<54x128xbf16>
    %cst_43 = arith.constant dense<0.000000e+00> : vector<8x128xf32>
    %38 = tpu.matmul %13, %37, %cst_43 {dimension_numbers = #tpu.dot_dimension_numbers<[1], [0], [0], [1], [0, 0, 1, 1], [], []>} : vector<8x54xbf16>, vector<54x128xbf16>, vector<8x128xf32> -> vector<8x128xf32>
    %39 = arith.addf %35, %38 : vector<8x128xf32>
    %40 = arith.maximumf %28, %39 : vector<8x128xf32>
    %c0_44 = arith.constant 0 : index
    %c0_45 = arith.constant 0 : index
    %c0_46 = arith.constant 0 : index
    %c0_47 = arith.constant 0 : index
    %41 = vector.load %arg3[%c0_44, %c0_45, %c0_46, %c0_47] : memref<2x3x54x128xbf16, #tpu.memory_space<vmem>>, vector<1x1x54x128xbf16>
    %42 = vector.shape_cast %41 : vector<1x1x54x128xbf16> to vector<54x128xbf16>
    %cst_48 = arith.constant dense<0.000000e+00> : vector<8x128xf32>
    %43 = tpu.matmul %9, %42, %cst_48 {dimension_numbers = #tpu.dot_dimension_numbers<[1], [0], [0], [1], [0, 0, 1, 1], [], []>} : vector<8x54xbf16>, vector<54x128xbf16>, vector<8x128xf32> -> vector<8x128xf32>
    %c0_49 = arith.constant 0 : index
    %c1_50 = arith.constant 1 : index
    %c0_51 = arith.constant 0 : index
    %c0_52 = arith.constant 0 : index
    %44 = vector.load %arg3[%c0_49, %c1_50, %c0_51, %c0_52] : memref<2x3x54x128xbf16, #tpu.memory_space<vmem>>, vector<1x1x54x128xbf16>
    %45 = vector.shape_cast %44 : vector<1x1x54x128xbf16> to vector<54x128xbf16>
    %cst_53 = arith.constant dense<0.000000e+00> : vector<8x128xf32>
    %46 = tpu.matmul %13, %45, %cst_53 {dimension_numbers = #tpu.dot_dimension_numbers<[1], [0], [0], [1], [0, 0, 1, 1], [], []>} : vector<8x54xbf16>, vector<54x128xbf16>, vector<8x128xf32> -> vector<8x128xf32>
    %47 = arith.addf %43, %46 : vector<8x128xf32>
    %c0_54 = arith.constant 0 : index
    %c2_55 = arith.constant 2 : index
    %c0_56 = arith.constant 0 : index
    %c0_57 = arith.constant 0 : index
    %48 = vector.load %arg3[%c0_54, %c2_55, %c0_56, %c0_57] : memref<2x3x54x128xbf16, #tpu.memory_space<vmem>>, vector<1x1x54x128xbf16>
    %49 = vector.shape_cast %48 : vector<1x1x54x128xbf16> to vector<54x128xbf16>
    %cst_58 = arith.constant dense<0.000000e+00> : vector<8x128xf32>
    %50 = tpu.matmul %17, %49, %cst_58 {dimension_numbers = #tpu.dot_dimension_numbers<[1], [0], [0], [1], [0, 0, 1, 1], [], []>} : vector<8x54xbf16>, vector<54x128xbf16>, vector<8x128xf32> -> vector<8x128xf32>
    %51 = arith.addf %47, %50 : vector<8x128xf32>
    %52 = arith.maximumf %40, %51 : vector<8x128xf32>
    %c1_59 = arith.constant 1 : index
    %c0_60 = arith.constant 0 : index
    %c0_61 = arith.constant 0 : index
    %c0_62 = arith.constant 0 : index
    %53 = vector.load %arg3[%c1_59, %c0_60, %c0_61, %c0_62] : memref<2x3x54x128xbf16, #tpu.memory_space<vmem>>, vector<1x1x54x128xbf16>
    %54 = vector.shape_cast %53 : vector<1x1x54x128xbf16> to vector<54x128xbf16>
    %cst_63 = arith.constant dense<0.000000e+00> : vector<8x128xf32>
    %55 = tpu.matmul %9, %54, %cst_63 {dimension_numbers = #tpu.dot_dimension_numbers<[1], [0], [0], [1], [0, 0, 1, 1], [], []>} : vector<8x54xbf16>, vector<54x128xbf16>, vector<8x128xf32> -> vector<8x128xf32>
    %c1_64 = arith.constant 1 : index
    %c1_65 = arith.constant 1 : index
    %c0_66 = arith.constant 0 : index
    %c0_67 = arith.constant 0 : index
    %56 = vector.load %arg3[%c1_64, %c1_65, %c0_66, %c0_67] : memref<2x3x54x128xbf16, #tpu.memory_space<vmem>>, vector<1x1x54x128xbf16>
    %57 = vector.shape_cast %56 : vector<1x1x54x128xbf16> to vector<54x128xbf16>
    %cst_68 = arith.constant dense<0.000000e+00> : vector<8x128xf32>
    %58 = tpu.matmul %13, %57, %cst_68 {dimension_numbers = #tpu.dot_dimension_numbers<[1], [0], [0], [1], [0, 0, 1, 1], [], []>} : vector<8x54xbf16>, vector<54x128xbf16>, vector<8x128xf32> -> vector<8x128xf32>
    %59 = arith.addf %55, %58 : vector<8x128xf32>
    %c1_69 = arith.constant 1 : index
    %c2_70 = arith.constant 2 : index
    %c0_71 = arith.constant 0 : index
    %c0_72 = arith.constant 0 : index
    %60 = vector.load %arg3[%c1_69, %c2_70, %c0_71, %c0_72] : memref<2x3x54x128xbf16, #tpu.memory_space<vmem>>, vector<1x1x54x128xbf16>
    %61 = vector.shape_cast %60 : vector<1x1x54x128xbf16> to vector<54x128xbf16>
    %cst_73 = arith.constant dense<0.000000e+00> : vector<8x128xf32>
    %62 = tpu.matmul %17, %61, %cst_73 {dimension_numbers = #tpu.dot_dimension_numbers<[1], [0], [0], [1], [0, 0, 1, 1], [], []>} : vector<8x54xbf16>, vector<54x128xbf16>, vector<8x128xf32> -> vector<8x128xf32>
    %63 = arith.addf %59, %62 : vector<8x128xf32>
    %64 = arith.maximumf %52, %63 : vector<8x128xf32>
    %c0_74 = arith.constant 0 : index
    %c0_75 = arith.constant 0 : index
    %65 = vector.load %arg4[%c0_74, %c0_75] : memref<1x128xf32, #tpu.memory_space<vmem>>, vector<1x128xf32>
    %66 = vector.broadcast %65 : vector<1x128xf32> to vector<8x128xf32>
    %67 = arith.addf %64, %66 : vector<8x128xf32>
    %cst_76 = arith.constant 0.000000e+00 : f32
    %68 = vector.broadcast %cst_76 : f32 to vector<8x128xf32>
    %69 = arith.maximumf %67, %68 : vector<8x128xf32>
    %70 = arith.truncf %69 : vector<8x128xf32> to vector<8x128xbf16>
    %c0_77 = arith.constant 0 : index
    %c0_78 = arith.constant 0 : index
    %c0_79 = arith.constant 0 : index
    %71 = vector.load %arg5[%c0_77, %c0_78, %c0_79] : memref<1x8x128xbf16, #tpu.memory_space<vmem>>, vector<1x8x128xbf16>
    %72 = vector.shape_cast %71 : vector<1x8x128xbf16> to vector<8x128xbf16>
    %73 = vector.shape_cast %70 : vector<8x128xbf16> to vector<1x8x128xbf16>
    tpu.vector_store %arg5[%c0_77, %c0_78, %c0_79], %73 {strides = array<i32>} : memref<1x8x128xbf16, #tpu.memory_space<vmem>>, vector<1x8x128xbf16>,
    return
  }
  func.func @transform_0(%arg0: i32) -> (i32, i32, i32) {
    %c0_i32 = arith.constant 0 : i32
    %c0_i32_0 = arith.constant 0 : i32
    %c0_i32_1 = arith.constant 0 : i32
    return %arg0, %c0_i32, %c0_i32_0 : i32, i32, i32
  }
  func.func @transform_1(%arg0: i32) -> (i32, i32, i32) {
    %c0_i32 = arith.constant 0 : i32
    %c0_i32_0 = arith.constant 0 : i32
    %c0_i32_1 = arith.constant 0 : i32
    %c0_i32_2 = arith.constant 0 : i32
    return %c0_i32, %c0_i32_0, %c0_i32_1 : i32, i32, i32
  }
  func.func @transform_2(%arg0: i32) -> (i32, i32, i32, i32) {
    %c0_i32 = arith.constant 0 : i32
    %c0_i32_0 = arith.constant 0 : i32
    %c0_i32_1 = arith.constant 0 : i32
    %c0_i32_2 = arith.constant 0 : i32
    %c0_i32_3 = arith.constant 0 : i32
    return %c0_i32, %c0_i32_0, %c0_i32_1, %c0_i32_2 : i32, i32, i32, i32
  }
  func.func @transform_3(%arg0: i32) -> (i32, i32) {
    %c0_i32 = arith.constant 0 : i32
    %c0_i32_0 = arith.constant 0 : i32
    %c0_i32_1 = arith.constant 0 : i32
    return %c0_i32, %c0_i32_0 : i32, i32
  }
  func.func @transform_4(%arg0: i32) -> (i32, i32, i32) {
    %c0_i32 = arith.constant 0 : i32
    %c0_i32_0 = arith.constant 0 : i32
    %c0_i32_1 = arith.constant 0 : i32
    return %arg0, %c0_i32, %c0_i32_0 : i32, i32, i32
  }
}

module attributes {stable_mosaic.version = 11 : i64} {
  func.func @_mlp_kernel(%arg0: i32, %arg1: memref<2x512xbf16, #tpu.memory_space<vmem>>, %arg2: memref<512x512xbf16, #tpu.memory_space<vmem>>, %arg3: memref<1x512xf32, #tpu.memory_space<vmem>>, %arg4: memref<512x7xbf16, #tpu.memory_space<vmem>>, %arg5: memref<1x7xf32, #tpu.memory_space<vmem>>, %arg6: memref<2x7xf32, #tpu.memory_space<vmem>>, %arg7: memref<2x512xf32, #tpu.memory_space<vmem>>) attributes {dimension_semantics = [#tpu.dimension_semantics<arbitrary>], iteration_bounds = array<i64: 2>, scalar_prefetch = 0 : i64, scratch_operands = 1 : i64, tpu.core_type = #tpu.core_type<tc>, window_params = [{transform_indices = @transform_0, window_bounds = array<i64: 2, 512>}, {transform_indices = @transform_1, window_bounds = array<i64: 512, 512>}, {pipeline_mode = #tpu.pipeline_mode<synchronous>, transform_indices = @transform_2, window_bounds = array<i64: 1, 512>}, {pipeline_mode = #tpu.pipeline_mode<synchronous>, transform_indices = @transform_3, window_bounds = array<i64: 512, 7>}, {pipeline_mode = #tpu.pipeline_mode<synchronous>, transform_indices = @transform_4, window_bounds = array<i64: 1, 7>}, {pipeline_mode = #tpu.pipeline_mode<synchronous>, transform_indices = @transform_5, window_bounds = array<i64: 2, 7>}]} {
    %c0_i32 = arith.constant 0 : i32
    %0 = arith.cmpi eq, %arg0, %c0_i32 : i32
    %1 = arith.extui %0 : i1 to i32
    %c0_i32_0 = arith.constant 0 : i32
    %2 = arith.cmpi ne, %1, %c0_i32_0 : i32
    scf.if %2 {
      %cst_9 = arith.constant 0.000000e+00 : f32
      %12 = vector.broadcast %cst_9 : f32 to vector<2x512xf32>
      %c0_10 = arith.constant 0 : index
      %c0_11 = arith.constant 0 : index
      %13 = vector.load %arg7[%c0_10, %c0_11] : memref<2x512xf32, #tpu.memory_space<vmem>>, vector<2x512xf32>
      tpu.vector_store %arg7[%c0_10, %c0_11], %12 {strides = array<i32>} : memref<2x512xf32, #tpu.memory_space<vmem>>, vector<2x512xf32>,
    } else {
    }
    %c0 = arith.constant 0 : index
    %c0_1 = arith.constant 0 : index
    %3 = vector.load %arg7[%c0, %c0_1] : memref<2x512xf32, #tpu.memory_space<vmem>>, vector<2x512xf32>
    %c0_2 = arith.constant 0 : index
    %c0_3 = arith.constant 0 : index
    %4 = vector.load %arg1[%c0_2, %c0_3] : memref<2x512xbf16, #tpu.memory_space<vmem>>, vector<2x512xbf16>
    %c0_4 = arith.constant 0 : index
    %c0_5 = arith.constant 0 : index
    %5 = vector.load %arg2[%c0_4, %c0_5] : memref<512x512xbf16, #tpu.memory_space<vmem>>, vector<512x512xbf16>
    %cst = arith.constant dense<0.000000e+00> : vector<2x512xf32>
    %6 = tpu.matmul %4, %5, %cst {dimension_numbers = #tpu.dot_dimension_numbers<[1], [0], [0], [1], [0, 0, 1, 1], [], []>} : vector<2x512xbf16>, vector<512x512xbf16>, vector<2x512xf32> -> vector<2x512xf32>
    %7 = arith.addf %3, %6 : vector<2x512xf32>
    %c0_6 = arith.constant 0 : index
    %c0_7 = arith.constant 0 : index
    %8 = vector.load %arg7[%c0_6, %c0_7] : memref<2x512xf32, #tpu.memory_space<vmem>>, vector<2x512xf32>
    tpu.vector_store %arg7[%c0_6, %c0_7], %7 {strides = array<i32>} : memref<2x512xf32, #tpu.memory_space<vmem>>, vector<2x512xf32>,
    %c1_i32 = arith.constant 1 : i32
    %9 = arith.cmpi eq, %arg0, %c1_i32 : i32
    %10 = arith.extui %9 : i1 to i32
    %c0_i32_8 = arith.constant 0 : i32
    %11 = arith.cmpi ne, %10, %c0_i32_8 : i32
    scf.if %11 {
      %c0_9 = arith.constant 0 : index
      %c0_10 = arith.constant 0 : index
      %12 = vector.load %arg7[%c0_9, %c0_10] : memref<2x512xf32, #tpu.memory_space<vmem>>, vector<2x512xf32>
      %c0_11 = arith.constant 0 : index
      %c0_12 = arith.constant 0 : index
      %13 = vector.load %arg3[%c0_11, %c0_12] : memref<1x512xf32, #tpu.memory_space<vmem>>, vector<1x512xf32>
      %14 = vector.broadcast %13 : vector<1x512xf32> to vector<2x512xf32>
      %15 = arith.addf %12, %14 : vector<2x512xf32>
      %cst_13 = arith.constant 0.000000e+00 : f32
      %16 = vector.broadcast %cst_13 : f32 to vector<2x512xf32>
      %17 = arith.maximumf %15, %16 : vector<2x512xf32>
      %18 = arith.truncf %17 : vector<2x512xf32> to vector<2x512xbf16>
      %c0_14 = arith.constant 0 : index
      %c0_15 = arith.constant 0 : index
      %19 = vector.load %arg4[%c0_14, %c0_15] : memref<512x7xbf16, #tpu.memory_space<vmem>>, vector<512x7xbf16>
      %cst_16 = arith.constant dense<0.000000e+00> : vector<2x7xf32>
      %20 = tpu.matmul %18, %19, %cst_16 {dimension_numbers = #tpu.dot_dimension_numbers<[1], [0], [0], [1], [0, 0, 1, 1], [], []>} : vector<2x512xbf16>, vector<512x7xbf16>, vector<2x7xf32> -> vector<2x7xf32>
      %c0_17 = arith.constant 0 : index
      %c0_18 = arith.constant 0 : index
      %21 = vector.load %arg5[%c0_17, %c0_18] : memref<1x7xf32, #tpu.memory_space<vmem>>, vector<1x7xf32>
      %22 = vector.broadcast %21 : vector<1x7xf32> to vector<2x7xf32>
      %23 = arith.addf %20, %22 : vector<2x7xf32>
      %c0_19 = arith.constant 0 : index
      %c0_20 = arith.constant 0 : index
      %24 = vector.load %arg6[%c0_19, %c0_20] : memref<2x7xf32, #tpu.memory_space<vmem>>, vector<2x7xf32>
      tpu.vector_store %arg6[%c0_19, %c0_20], %23 {strides = array<i32>} : memref<2x7xf32, #tpu.memory_space<vmem>>, vector<2x7xf32>,
    } else {
    }
    return
  }
  func.func @transform_0(%arg0: i32) -> (i32, i32) {
    %c0_i32 = arith.constant 0 : i32
    %c0_i32_0 = arith.constant 0 : i32
    return %c0_i32, %arg0 : i32, i32
  }
  func.func @transform_1(%arg0: i32) -> (i32, i32) {
    %c0_i32 = arith.constant 0 : i32
    %c0_i32_0 = arith.constant 0 : i32
    return %arg0, %c0_i32 : i32, i32
  }
  func.func @transform_2(%arg0: i32) -> (i32, i32) {
    %c0_i32 = arith.constant 0 : i32
    %c0_i32_0 = arith.constant 0 : i32
    %c0_i32_1 = arith.constant 0 : i32
    return %c0_i32, %c0_i32_0 : i32, i32
  }
  func.func @transform_3(%arg0: i32) -> (i32, i32) {
    %c0_i32 = arith.constant 0 : i32
    %c0_i32_0 = arith.constant 0 : i32
    %c0_i32_1 = arith.constant 0 : i32
    return %c0_i32, %c0_i32_0 : i32, i32
  }
  func.func @transform_4(%arg0: i32) -> (i32, i32) {
    %c0_i32 = arith.constant 0 : i32
    %c0_i32_0 = arith.constant 0 : i32
    %c0_i32_1 = arith.constant 0 : i32
    return %c0_i32, %c0_i32_0 : i32, i32
  }
  func.func @transform_5(%arg0: i32) -> (i32, i32) {
    %c0_i32 = arith.constant 0 : i32
    %c0_i32_0 = arith.constant 0 : i32
    %c0_i32_1 = arith.constant 0 : i32
    return %c0_i32, %c0_i32_0 : i32, i32
  }
}

</mosaic_0001>

<bundles_post_ra>
// kernel: tile.8
= control target key start
LH: loop header
LB: loop body
LE: loop exit
PB: predicated region body
PF: predicated region fallthrough
CT: control target
= control target key end

     0   :  { %s22_s0 = inlined_call_operand.vmem [shape: f32[16], index: 0, kind: input, shape index: {}]   ;;  %s23_s1 = inlined_call_operand.vmem [shape: f32[8,16], index: 1, kind: output, shape index: {}]  }
   0x1   :  { %v4_v0 = vld [vmem:[%s22_s0] ss:$0 sm:$0xff] }
   0x2   :  { %5 = vst [vmem:[%s23_s1] sm:$0xff] %v4_v0 }

// kernel: tile.9
= control target key start
LH: loop header
LB: loop body
LE: loop exit
PB: predicated region body
PF: predicated region fallthrough
CT: control target
= control target key end

     0   :  { %s67_s10 = smov 112   ;;  %s68_s11 = smov 80   ;;  %vm3_vm0 = vcmask 130048   ;;  %vm9_vm1 = vcmask 1048448   ;;  %vm15_vm2 = vcmask 917248   ;;  %vm21_vm3 = vcmask 786048   ;;  %s111_s0 = inlined_call_operand.vmem [shape: f32[8,16], index: 0, kind: input, shape index: {}]   ;;  %s112_s1 = inlined_call_operand.vmem [shape: f32[1,128], index: 1, kind: output, shape index: {}]  }
   0x1   :  { %v53_v0 = vld [vmem:[%s111_s0 + $0x7] sm:$0x1]   ;;  %v55_v1 = vld [vmem:[%s111_s0 + $0x5] sm:$0x1]   ;;  %v54_v2 = vld [vmem:[%s111_s0 + $0x6] sm:$0x1]  }
   0x2   :  { %7 = vrot.lane.b32.xlu0 %v53_v0, %s67_s10  ;;  %19 = vrot.lane.b32.xlu1 %v55_v1, %s68_s11  ;;  %v56_v3 = vld [vmem:[%s111_s0 + $0x4] sm:$0x1]   ;;  %v2_v4 = vld [vmem:[%s111_s0] sm:$0x1]   ;;  %s69_s18 = smov 96   ;;  %s70_s19 = smov 64  }
   0x3   :  { %4 = vst.msk [vmem:[#allocation0] sm:$0x1] %vm3_vm0, %v2_v4   ;;  %v57_v5 = vld [vmem:[%s111_s0 + $0x3] sm:$0x1]   ;;  %v58_v6 = vld [vmem:[%s111_s0 + $0x2] sm:$0x1]  }
   0x4   :  { %s71_s24 = smov 48   ;;  %s72_s25 = smov 32   ;;  %v59_v7 = vld [vmem:[%s111_s0 + $0x1] sm:$0x1]   ;;  %vm27_vm4 = vcmask 654848   ;;  %vm33_vm5 = vcmask 523648  }
   0x5   :  { %s73_s0 = smov 16   ;;  %vm39_vm6 = vcmask 392448   ;;  %vm45_vm7 = vcmask 261248  }
   0x6   :  { %13 = vrot.lane.b32.xlu0 %v54_v2, %s69_s18  ;;  %25 = vrot.lane.b32.xlu1 %v56_v3, %s70_s19 }
   0xa   :  { %31 = vrot.lane.b32.xlu0 %v57_v5, %s71_s24  ;;  %37 = vrot.lane.b32.xlu1 %v58_v6, %s72_s25 }
   0xe   :  { %43 = vrot.lane.b32.xlu0 %v59_v7, %s73_s0 }
  0x74   :  { %v8_v8 = vpop.permute.xlu0 %7   ;;  %v20_v9 = vpop.permute.xlu1 %19  }
  0x75   :  { %10 = vst.msk [vmem:[#allocation0] sm:$0x1] %vm9_vm1, %v8_v8  }
  0x78   :  { %v14_v10 = vpop.permute.xlu0 %13   ;;  %v26_v11 = vpop.permute.xlu1 %25  }
  0x79   :  { %16 = vst.msk [vmem:[#allocation0] sm:$0x1] %vm15_vm2, %v14_v10  }
  0x7a   :  { %22 = vst.msk [vmem:[#allocation0] sm:$0x1] %vm21_vm3, %v20_v9  }
  0x7b   :  { %28 = vst.msk [vmem:[#allocation0] sm:$0x1] %vm27_vm4, %v26_v11  }
  0x7c   :  { %v32_v12 = vpop.permute.xlu0 %31   ;;  %v38_v13 = vpop.permute.xlu1 %37  }
  0x7d   :  { %34 = vst.msk [vmem:[#allocation0] sm:$0x1] %vm33_vm5, %v32_v12  }
  0x7e   :  { %40 = vst.msk [vmem:[#allocation0] sm:$0x1] %vm39_vm6, %v38_v13  }
  0x80   :  { %v44_v14 = vpop.permute.xlu0 %43  }
  0x81   :  { %46 = vst.msk [vmem:[#allocation0] sm:$0x1] %vm45_vm7, %v44_v14  }
  0x88   :  { %v50_v15 = vld [vmem:[#allocation0] sm:$0x1] }
  0x89   :  { %52 = vst [vmem:[%s112_s1] sm:$0x1] %v50_v15 }

// kernel: visuomotor_forward.2
= control target key start
LH: loop header
LB: loop body
LE: loop exit
PB: predicated region body
PF: predicated region fallthrough
CT: control target
= control target key end

     0   :  { %s1595_s15 = smov 0   ;;  %s1919_s0 = inlined_call_operand.vmem [shape: bf16[2,18,54], index: 0, kind: input, shape index: {}]   ;;  %s1920_s1 = inlined_call_operand.vmem [shape: bf16[4,8,18], index: 1, kind: input, shape index: {}]   ;;  %s1921_s2 = inlined_call_operand.vmem [shape: bf16[2,3,54,128], index: 2, kind: input, shape index: {}]   ;;  %s1922_s3 = inlined_call_operand.vmem [shape: f32[1,128], index: 3, kind: input, shape index: {}]   ;;  %s1923_s4 = inlined_call_operand.vmem [shape: bf16[2,8,128], index: 4, kind: output, shape index: {}]  }
   0x1 LB: > { %s1153_s16 = sadd.s32 4294967295, %s1566_s15   ;;  %p1157_p0 = scmp.ge.s32.totalorder %s1566_s15, 1  ;;  %s1566_s15 = sphi %s1595_s15, %s14_s15  }
   0x2   : > { %p162_p1 = scmp.lt.s32.totalorder %s1566_s15, 3 }
   0x4   : > { %p163_p2 = pnand %p1157_p0, %p162_p1 }
   0x5   : > { %p187_p3 = scmp.lt.s32.totalorder (!%p163_p2), %s1153_s16, 1  ;;  %v1568_v0 = vmov (!%p163_p2), 0.0   ;;  %vm1569_vm0 = vmmov (!%p163_p2), 0   ;;  %vm214_vm1 = vcmask (!%p163_p2), 1040384   ;;  %vm210_vm2 = vcmask (!%p163_p2), 146432   ;;  %v1636_v6 = vld [vmem:[%s1921_s2 + $0x1c] sm:$0xff] (!%p163_p2)  }
   0x6   : > { %166 = sbr.rel (%p163_p2) target bundleno = 542 (0x21e), region = 36  ;;  %1323 = vmatprep.subr.bf16.mxu1 (!%p163_p2), %v1568_v0  ;;  %1327 = vmatprep.mubr.msk.bf16.mxu1 (!%p163_p2), %vm1569_vm0, %v1568_v0  ;;  %v1163_v4 = vld [vmem:[%s1920_s1 + $0x4] sm:$0xf] (!%p163_p2)  ;;  %v200_v5 = vld [vmem:[%s1920_s1] sm:$0xf] (!%p163_p2)  ;;  %v1648_v9 = vld [vmem:[%s1921_s2 + $0x70] sm:$0xff] (!%p163_p2)  }
   0x7   : > { %1315 = vmatprep.subr.bf16.mxu0 (!%p163_p2), %v1568_v0  ;;  %1319 = vmatprep.mubr.msk.bf16.mxu0 (!%p163_p2), %vm1569_vm0, %v1568_v0  ;;  %v1165_v7 = vld [vmem:[%s1920_s1 + $0x8] sm:$0xf] (!%p163_p2)  ;;  %v1167_v8 = vld [vmem:[%s1920_s1 + $0xc] sm:$0xf] (!%p163_p2)  ;;  %v1664_v11 = vld [vmem:[%s1921_s2 + $0x78] sm:$0xff] (!%p163_p2)   ;;  %vm437_vm3 = vcmask (!%p163_p2), 1042432  }
   0x8   : > { %v1657_v10 = vld [vmem:[%s1921_s2 + $0x24] sm:$0xff] (!%p163_p2)   ;;  %v1675_v12 = vld [vmem:[%s1921_s2 + $0x2c] sm:$0xff] (!%p163_p2)   ;;  %v1542_v14 = vld [vmem:[%s1921_s2 + $0x34] ss:$0 sps:$4 sm:$0x77] (!%p163_p2)   ;;  %vm433_vm4 = vcmask (!%p163_p2), 441344  }
   0x9   : > { %v1682_v13 = vld [vmem:[%s1921_s2 + $0x80] sm:$0xff] (!%p163_p2)   ;;  %v1543_v15 = vld [vmem:[%s1921_s2 + $0x88] ss:$0 sps:$4 sm:$0x77] (!%p163_p2)   ;;  %v1695_v16 = vsel (!%p163_p2), %vm437_vm3, %v1542_v14, 0  ;;  %v1713_v20 = vld [vmem:[%s1921_s2 + $0x54] sm:$0xff] (!%p163_p2)  }
   0xa   : > { %v1699_v17 = vsel (!%p163_p2), %vm437_vm3, %v1543_v15, 0  ;;  %v1708_v19 = vld [vmem:[%s1921_s2] sm:$0xff] (!%p163_p2)   ;;  %v1726_v29 = vld [vmem:[%s1921_s2 + $0x8] sm:$0xff] (!%p163_p2)   ;;  %v1744_v31 = vld [vmem:[%s1921_s2 + $0x10] sm:$0xff] (!%p163_p2)  }
   0xb   : > { %v1731_v30 = vld [vmem:[%s1921_s2 + $0x5c] sm:$0xff] (!%p163_p2)   ;;  %v1749_v32 = vld [vmem:[%s1921_s2 + $0x64] sm:$0xff] (!%p163_p2)   ;;  %v1550_v33 = vld [vmem:[%s1921_s2 + $0x18] ss:$0 sps:$4 sm:$0x77] (!%p163_p2)  }
   0xc   : > { %v1551_v35 = vld [vmem:[%s1921_s2 + $0x6c] ss:$0 sps:$4 sm:$0x77] (!%p163_p2)   ;;  %v1766_v43 = vsel (!%p163_p2), %vm437_vm3, %v1550_v33, 0  ;;  %v1776_v46 = vld [vmem:[%s1921_s2 + $0x38] sm:$0xff] (!%p163_p2)   ;;  %v1792_v48 = vld [vmem:[%s1921_s2 + $0x40] sm:$0xff] (!%p163_p2)  }
   0xd   : > { %s1925_s16 = smov (!%p187_p3, %s1153_s16), 1  ;;  %v1769_v44 = vsel %vm437_vm3, %v1551_v35, 0  ;;  %v1781_v47 = vld [vmem:[%s1921_s2 + $0x8c] sm:$0xff]   ;;  %v1797_v49 = vld [vmem:[%s1921_s2 + $0x94] sm:$0xff]   ;;  %v1815_v51 = vld [vmem:[%s1921_s2 + $0x9c] sm:$0xff]  }
   0xe   : > { %s1523_s17 = smul.u32 12, %s1925_s16  ;;  %v1810_v50 = vld [vmem:[%s1921_s2 + $0x48] sm:$0xff]   ;;  %v1558_v52 = vld [vmem:[%s1921_s2 + $0x50] ss:$0 sps:$4 sm:$0x77]   ;;  %s1159_s5 = sshll.u32 %s1925_s16, 2 }
   0xf   : > { %v1559_v53 = vld [vmem:[%s1921_s2 + $0xa4] ss:$0 sps:$4 sm:$0x77]   ;;  %v1830_v54 = vsel %vm437_vm3, %v1558_v52, 0  ;;  %s195_s8 = scalar_lea.vmem %s1923_s4, %s1159_s5 }
  0x10   : > { %s191_s20 = scalar_lea.vmem %s1919_s0, %s1523_s17  ;;  %v1833_v55 = vsel %vm437_vm3, %v1559_v53, 0 }
  0x11   : > { %v1534_v1 = vld [vmem:[%s191_s20] sm:$0xff]   ;;  %v1535_v2 = vld [vmem:[%s191_s20 + $0x8] ss:$0 sps:$4 sm:$0x11]  }
  0x12   : > { %1324 = vmatpush3.bf16.msra.mxu1 %v1534_v1  ;;  %1316 = vmatpush3.bf16.msra.mxu0 %v1534_v1  ;;  %v216_v3 = vsel %vm214_vm1, %v1535_v2, 0 }
  0x13   : > { %1325 = vmatprep.subr.bf16.mxu1 %v1568_v0  ;;  %1317 = vmatprep.subr.bf16.mxu0 %v1568_v0 }
  0x16   : > { %1326 = vmatpush3.bf16.msra.mxu1 %v216_v3  ;;  %1318 = vmatpush3.bf16.msra.mxu0 %v216_v3 }
  0x17   : > { %1331 = vmatprep.subr.bf16.mxu0 %v1568_v0  ;;  %1339 = vmatprep.subr.bf16.mxu1 %v1568_v0 }
  0x19   : > { %1328 = vmatmul.mubr.msk.bf16.vlgmr.msra.gmra.mrb[0].mxu1 %vm210_vm2, %v1163_v4  ;;  %1320 = vmatmul.mubr.msk.bf16.vlgmr.msra.gmra.mrb[0].mxu0 %vm210_vm2, %v200_v5 }
  0x1a   : > { %1332 = vmatpush3.bf16.msra.mxu0 %v1534_v1  ;;  %1335 = vmatprep.mubr.msk.bf16.mxu0 %vm1569_vm0, %v1568_v0 }
  0x1b   : > { %1333 = vmatprep.subr.bf16.mxu0 %v1568_v0  ;;  %1340 = vmatpush3.bf16.msra.mxu1 %v1534_v1 }
  0x1c   : > { %1341 = vmatprep.subr.bf16.mxu1 %v1568_v0  ;;  %1343 = vmatprep.mubr.msk.bf16.mxu1 %vm1569_vm0, %v1568_v0 }
  0x1e   : > { %1334 = vmatpush3.bf16.msra.mxu0 %v216_v3 }
  0x1f   : > { %1342 = vmatpush3.bf16.msra.mxu1 %v216_v3  ;;  %1347 = vmatprep.subr.bf16.mxu0 %v1568_v0 }
  0x20   : > { %1383 = vmatprep.subr.bf16.mxu1 %v1568_v0 }
  0x21   : > { %1336 = vmatmul.mubr.msk.bf16.vlgmr.msra.gmra.mrb[4].mxu0 %vm210_vm2, %v1165_v7 }
  0x22   : > { %1344 = vmatmul.mubr.msk.bf16.vlgmr.msra.gmra.mrb[4].mxu1 %vm210_vm2, %v1167_v8  ;;  %1348 = vmatpush3.bf16.msra.mxu0 %v1636_v6  ;;  %v1240_v8 = vld [vmem:[%s1922_s3] ss:$0 sm:$0xff] }
  0x23   : > { %1384 = vmatpush3.bf16.msra.mxu1 %v1648_v9  ;;  %1349 = vmatprep.subr.bf16.mxu0 %v1568_v0 }
  0x24   : > { %1385 = vmatprep.subr.bf16.mxu1 %v1568_v0  ;;  %1355 = vmatprep.mubr.msk.bf16.mxu0 %vm1569_vm0, %v1568_v0 }
  0x25   : > { %1391 = vmatprep.mubr.msk.bf16.mxu1 %vm1569_vm0, %v1568_v0 }
  0x26   : > { %1350 = vmatpush3.bf16.msra.mxu0 %v1657_v10 }
  0x27   : > { %1386 = vmatpush3.bf16.msra.mxu1 %v1664_v11  ;;  %1351 = vmatprep.subr.bf16.mxu0 %v1568_v0 }
  0x28   : > { %1387 = vmatprep.subr.bf16.mxu1 %v1568_v0 }
  0x2a   : > { %1352 = vmatpush3.bf16.msra.mxu0 %v1675_v12 }
  0x2b   : > { %1388 = vmatpush3.bf16.msra.mxu1 %v1682_v13  ;;  %1353 = vmatprep.subr.bf16.mxu0 %v1568_v0 }
  0x2c   : > { %1389 = vmatprep.subr.bf16.mxu1 %v1568_v0 }
  0x2e   : > { %1354 = vmatpush3.bf16.msra.mxu0 %v1695_v16 }
  0x2f   : > { %1390 = vmatpush3.bf16.msra.mxu1 %v1699_v17  ;;  %1359 = vmatprep.subr.bf16.mxu0 %v1568_v0 }
  0x30   : > { %1395 = vmatprep.subr.bf16.mxu1 %v1568_v0 }
  0xec   : > { %v298_v18 = vpop.f32.mrb[0].mxu1  ;;  %v252_v21 = vpop.f32.mrb[0].mxu0 }
  0xed   : > { %v1715_v22 = vpack.c.bf16 %v298_v18, %v298_v18  ;;  %v1329_v23 = vpop.f32.mrb[1].mxu1  ;;  %v1321_v24 = vpop.f32.mrb[1].mxu0  ;;  %v258_v45 = vpack.c.bf16 %v252_v21, %v252_v21 }
  0xee   : > { %v301_v25 = vpop.f32.mrb[2].mxu1  ;;  %v255_v26 = vpop.f32.mrb[2].mxu0 }
  0xef   : > { %v1330_v27 = vpop.f32.mrb[3].mxu1  ;;  %1356 = vmatmul.mubr.msk.bf16.vlgmr.msra.gmra.mrb[8].mxu0 %vm433_vm4, %v1715_v22  ;;  %1392 = vmatmul.mubr.msk.bf16.vlgmr.msra.gmra.mrb[8].mxu1 %vm433_vm4, %v1715_v22  ;;  %v1322_v28 = vpop.f32.mrb[3].mxu0 }
  0xf0   : > { %1360 = vmatpush3.bf16.msra.mxu0 %v1708_v19  ;;  %1396 = vmatpush3.bf16.msra.mxu1 %v1713_v20 }
  0xf1   : > { %1361 = vmatprep.subr.bf16.mxu0 %v1568_v0  ;;  %1397 = vmatprep.subr.bf16.mxu1 %v1568_v0 }
  0xf2   : > { %1367 = vmatprep.mubr.msk.bf16.mxu0 %vm1569_vm0, %v1568_v0  ;;  %1403 = vmatprep.mubr.msk.bf16.mxu1 %vm1569_vm0, %v1568_v0 }
  0xf4   : > { %1362 = vmatpush3.bf16.msra.mxu0 %v1726_v29  ;;  %1398 = vmatpush3.bf16.msra.mxu1 %v1731_v30  ;;  %v344_v34 = vpop.f32.mrb[4].mxu0 }
  0xf5   : > { %1363 = vmatprep.subr.bf16.mxu0 %v1568_v0  ;;  %1399 = vmatprep.subr.bf16.mxu1 %v1568_v0  ;;  %v1337_v36 = vpop.f32.mrb[5].mxu0  ;;  %v1759_v37 = vpop.f32.mrb[4].mxu1  ;;  %v350_v56 = vpack.c.bf16 %v344_v34, %v344_v34 }
  0xf6   : > { %v347_v38 = vpop.f32.mrb[6].mxu0  ;;  %v1345_v39 = vpop.f32.mrb[5].mxu1  ;;  %v396_v57 = vpack.c.bf16 %v1759_v37, %v1759_v37 }
  0xf7   : > { %v1338_v40 = vpop.f32.mrb[7].mxu0  ;;  %v393_v41 = vpop.f32.mrb[6].mxu1 }
  0xf8   : > { %1364 = vmatpush3.bf16.msra.mxu0 %v1744_v31  ;;  %1400 = vmatpush3.bf16.msra.mxu1 %v1749_v32  ;;  %v1346_v42 = vpop.f32.mrb[7].mxu1 }
  0xf9   : > { %1365 = vmatprep.subr.bf16.mxu0 %v1568_v0  ;;  %1401 = vmatprep.subr.bf16.mxu1 %v1568_v0 }
  0xfc   : > { %1366 = vmatpush3.bf16.msra.mxu0 %v1766_v43  ;;  %1402 = vmatpush3.bf16.msra.mxu1 %v1769_v44 }
  0xfd   : > { %1371 = vmatprep.subr.bf16.mxu0 %v1568_v0  ;;  %1407 = vmatprep.subr.bf16.mxu1 %v1568_v0 }
  0xff   : > { %1368 = vmatmul.mubr.msk.bf16.vlgmr.msra.gmra.mrb[8].mxu0 %vm433_vm4, %v258_v45  ;;  %1404 = vmatmul.mubr.msk.bf16.vlgmr.msra.gmra.mrb[8].mxu1 %vm433_vm4, %v258_v45 }
 0x100   : > { %1372 = vmatpush3.bf16.msra.mxu0 %v1776_v46  ;;  %1408 = vmatpush3.bf16.msra.mxu1 %v1781_v47 }
 0x101   : > { %1373 = vmatprep.subr.bf16.mxu0 %v1568_v0  ;;  %1409 = vmatprep.subr.bf16.mxu1 %v1568_v0 }
 0x102   : > { %1379 = vmatprep.mubr.msk.bf16.mxu0 %vm1569_vm0, %v1568_v0  ;;  %1415 = vmatprep.mubr.msk.bf16.mxu1 %vm1569_vm0, %v1568_v0 }
 0x104   : > { %1374 = vmatpush3.bf16.msra.mxu0 %v1792_v48  ;;  %1410 = vmatpush3.bf16.msra.mxu1 %v1797_v49 }
 0x105   : > { %1375 = vmatprep.subr.bf16.mxu0 %v1568_v0  ;;  %1411 = vmatprep.subr.bf16.mxu1 %v1568_v0 }
 0x108   : > { %1376 = vmatpush3.bf16.msra.mxu0 %v1810_v50  ;;  %1412 = vmatpush3.bf16.msra.mxu1 %v1815_v51 }
 0x109   : > { %1377 = vmatprep.subr.bf16.mxu0 %v1568_v0  ;;  %1413 = vmatprep.subr.bf16.mxu1 %v1568_v0 }
 0x10c   : > { %1378 = vmatpush3.bf16.msra.mxu0 %v1830_v54  ;;  %1414 = vmatpush3.bf16.msra.mxu1 %v1833_v55 }
 0x10d   : > { %1419 = vmatprep.subr.bf16.mxu0 %v1568_v0  ;;  %1455 = vmatprep.subr.bf16.mxu1 %v1568_v0 }
 0x10f   : > { %1380 = vmatmul.mubr.msk.bf16.vlgmr.msra.gmra.mrb[8].mxu0 %vm433_vm4, %v350_v56  ;;  %1416 = vmatmul.mubr.msk.bf16.vlgmr.msra.gmra.mrb[8].mxu1 %vm433_vm4, %v350_v56 }
 0x110   : > { %1420 = vmatpush3.bf16.msra.mxu0 %v1636_v6  ;;  %1456 = vmatpush3.bf16.msra.mxu1 %v1648_v9 }
 0x111   : > { %1421 = vmatprep.subr.bf16.mxu0 %v1568_v0  ;;  %1457 = vmatprep.subr.bf16.mxu1 %v1568_v0 }
 0x112   : > { %1427 = vmatprep.mubr.msk.bf16.mxu0 %vm1569_vm0, %v1568_v0  ;;  %1463 = vmatprep.mubr.msk.bf16.mxu1 %vm1569_vm0, %v1568_v0 }
 0x114   : > { %1422 = vmatpush3.bf16.msra.mxu0 %v1657_v10  ;;  %1458 = vmatpush3.bf16.msra.mxu1 %v1664_v11 }
 0x115   : > { %1423 = vmatprep.subr.bf16.mxu0 %v1568_v0  ;;  %1459 = vmatprep.subr.bf16.mxu1 %v1568_v0 }
 0x118   : > { %1424 = vmatpush3.bf16.msra.mxu0 %v1675_v12  ;;  %1460 = vmatpush3.bf16.msra.mxu1 %v1682_v13 }
 0x119   : > { %1425 = vmatprep.subr.bf16.mxu0 %v1568_v0  ;;  %1461 = vmatprep.subr.bf16.mxu1 %v1568_v0 }
 0x11c   : > { %1426 = vmatpush3.bf16.msra.mxu0 %v1695_v16  ;;  %1462 = vmatpush3.bf16.msra.mxu1 %v1699_v17 }
 0x11d   : > { %1431 = vmatprep.subr.bf16.mxu0 %v1568_v0  ;;  %1467 = vmatprep.subr.bf16.mxu1 %v1568_v0 }
 0x11f   : > { %1428 = vmatmul.mubr.msk.bf16.vlgmr.msra.gmra.mrb[12].mxu0 %vm433_vm4, %v350_v56  ;;  %1464 = vmatmul.mubr.msk.bf16.vlgmr.msra.gmra.mrb[12].mxu1 %vm433_vm4, %v350_v56 }
 0x120   : > { %1432 = vmatpush3.bf16.msra.mxu0 %v1708_v19  ;;  %1468 = vmatpush3.bf16.msra.mxu1 %v1713_v20 }
 0x121   : > { %1433 = vmatprep.subr.bf16.mxu0 %v1568_v0  ;;  %1469 = vmatprep.subr.bf16.mxu1 %v1568_v0 }
 0x122   : > { %1439 = vmatprep.mubr.msk.bf16.mxu0 %vm1569_vm0, %v1568_v0  ;;  %1475 = vmatprep.mubr.msk.bf16.mxu1 %vm1569_vm0, %v1568_v0 }
 0x124   : > { %1434 = vmatpush3.bf16.msra.mxu0 %v1726_v29  ;;  %1470 = vmatpush3.bf16.msra.mxu1 %v1731_v30 }
 0x125   : > { %1435 = vmatprep.subr.bf16.mxu0 %v1568_v0  ;;  %1471 = vmatprep.subr.bf16.mxu1 %v1568_v0 }
 0x128   : > { %1436 = vmatpush3.bf16.msra.mxu0 %v1744_v31  ;;  %1472 = vmatpush3.bf16.msra.mxu1 %v1749_v32 }
 0x129   : > { %1437 = vmatprep.subr.bf16.mxu0 %v1568_v0  ;;  %1473 = vmatprep.subr.bf16.mxu1 %v1568_v0 }
 0x12c   : > { %1438 = vmatpush3.bf16.msra.mxu0 %v1766_v43  ;;  %1474 = vmatpush3.bf16.msra.mxu1 %v1769_v44 }
 0x12d   : > { %1443 = vmatprep.subr.bf16.mxu0 %v1568_v0  ;;  %1479 = vmatprep.subr.bf16.mxu1 %v1568_v0 }
 0x12f   : > { %1440 = vmatmul.mubr.msk.bf16.vlgmr.msra.gmra.mrb[12].mxu0 %vm433_vm4, %v1715_v22  ;;  %1476 = vmatmul.mubr.msk.bf16.vlgmr.msra.gmra.mrb[12].mxu1 %vm433_vm4, %v1715_v22 }
 0x130   : > { %1444 = vmatpush3.bf16.msra.mxu0 %v1776_v46  ;;  %1480 = vmatpush3.bf16.msra.mxu1 %v1781_v47 }
 0x131   : > { %1445 = vmatprep.subr.bf16.mxu0 %v1568_v0  ;;  %1481 = vmatprep.subr.bf16.mxu1 %v1568_v0 }
 0x132   : > { %1451 = vmatprep.mubr.msk.bf16.mxu0 %vm1569_vm0, %v1568_v0  ;;  %1487 = vmatprep.mubr.msk.bf16.mxu1 %vm1569_vm0, %v1568_v0 }
 0x134   : > { %1446 = vmatpush3.bf16.msra.mxu0 %v1792_v48  ;;  %1482 = vmatpush3.bf16.msra.mxu1 %v1797_v49 }
 0x135   : > { %1447 = vmatprep.subr.bf16.mxu0 %v1568_v0  ;;  %1483 = vmatprep.subr.bf16.mxu1 %v1568_v0 }
 0x138   : > { %1448 = vmatpush3.bf16.msra.mxu0 %v1810_v50  ;;  %1484 = vmatpush3.bf16.msra.mxu1 %v1815_v51 }
 0x139   : > { %1449 = vmatprep.subr.bf16.mxu0 %v1568_v0  ;;  %1485 = vmatprep.subr.bf16.mxu1 %v1568_v0 }
 0x13c   : > { %1450 = vmatpush3.bf16.msra.mxu0 %v1830_v54  ;;  %1486 = vmatpush3.bf16.msra.mxu1 %v1833_v55 }
 0x13f   : > { %1452 = vmatmul.mubr.msk.bf16.vlgmr.msra.gmra.mrb[12].mxu0 %vm433_vm4, %v396_v57  ;;  %1488 = vmatmul.mubr.msk.bf16.vlgmr.msra.gmra.mrb[12].mxu1 %vm433_vm4, %v396_v57 }
 0x1e2   : > { %v617_v58 = vpop.f32.mrb[8].mxu0  ;;  %v834_v59 = vpop.f32.mrb[8].mxu1 }
 0x1e3   : > { %v841_v60 = vmax.f32 %v617_v58, %v834_v59  ;;  %v1381_v61 = vpop.f32.mrb[9].mxu0  ;;  %v1417_v62 = vpop.f32.mrb[9].mxu1 }
 0x1e4   : > { %v620_v63 = vpop.f32.mrb[10].mxu0  ;;  %v837_v1 = vpop.f32.mrb[10].mxu1 }
 0x1e5   : > { %v1382_v0 = vpop.f32.mrb[11].mxu0  ;;  %v1418_v2 = vpop.f32.mrb[11].mxu1 }
 0x212   : > { %v959_v3 = vpop.f32.mrb[12].mxu0  ;;  %v1081_v4 = vpop.f32.mrb[12].mxu1 }
 0x213   : > { %v966_v5 = vmax.f32 %v841_v60, %v959_v3  ;;  %v1453_v6 = vpop.f32.mrb[13].mxu0  ;;  %v1489_v7 = vpop.f32.mrb[13].mxu1 }
 0x214   : > { %v962_v9 = vpop.f32.mrb[14].mxu0  ;;  %v1084_v10 = vpop.f32.mrb[14].mxu1 }
 0x215   : > { %v1088_v11 = vmax.f32 %v966_v5, %v1081_v4  ;;  %v1454_v12 = vpop.f32.mrb[15].mxu0  ;;  %v1490_v13 = vpop.f32.mrb[15].mxu1 }
 0x217   : > { %v1096_v14 = vadd.f32 %v1240_v8, %v1088_v11 }
 0x219   : > { %v1097_v15 = vmax.f32 %v1096_v14, 0.0 }
 0x21b   : > { %v1098_v16 = vpack.c.bf16 %v1097_v15, %v1097_v15 }
 0x21d   : > { %1099 = vst [vmem:[%s195_s8] sm:$0xf] %v1098_v16 }
 0x21e PF: > { %s14_s15 = sadd.s32 1, %s1566_s15  }
 0x21f   : > { %p11_p4 = scmp.ge.s32.totalorder %s14_s15, 4  }
 0x221   :  { %13 = sbr.rel (!%p11_p4) target bundleno = 1 (0x1), region = 74 }

// kernel: visuomotor_forward.3
= control target key start
LH: loop header
LB: loop body
LE: loop exit
PB: predicated region body
PF: predicated region fallthrough
CT: control target
= control target key end

     0   :  { %10 = vsyncpa [#allocation4], 0  ;;  %s2240_s18 = smov 0   ;;  %s2548_s0 = inlined_call_operand.vmem [shape: bf16[2,1024], index: 0, kind: input, shape index: {}]   ;;  %s2549_s1 = inlined_call_operand.vmem [shape: bf16[1024,512], index: 1, kind: input, shape index: {}]   ;;  %s2550_s2 = inlined_call_operand.vmem [shape: f32[1,512], index: 2, kind: input, shape index: {}]   ;;  %s2551_s3 = inlined_call_operand.vmem [shape: bf16[512,7], index: 3, kind: input, shape index: {}]   ;;  %s2552_s4 = inlined_call_operand.vmem [shape: f32[1,7], index: 4, kind: input, shape index: {}]   ;;  %s2553_s5 = inlined_call_operand.hbm [shape: f32[2,7], index: 5, kind: output, shape index: {}]  }
   0x1 LB: > { %s2246_s19 = sadd.s32 4294967295, %s2204_s18   ;;  %p1700_p0 = scmp.ge.s32.totalorder %s2204_s18, 1  ;;  %s2204_s18 = sphi %s2240_s18, %s16_s18  }
   0x2   : > { %p195_p1 = scmp.lt.s32.totalorder %s2204_s18, 3 }
   0x4   : > { %p196_p2 = pnand %p1700_p0, %p195_p1 }
   0x5   : > { %s1701_s20 = sshll.u32 (!%p196_p2), %s2246_s19, 2  ;;  %s1702_s21 = sshll.u32 (!%p196_p2), %s2246_s19, 6 }
   0x6   : > { %199 = sbr.rel (%p196_p2) target bundleno = 636 (0x27c), region = 40  ;;  %p224_p3 = scmp.lt.s32.totalorder (!%p196_p2), %s1701_s20, 7 }
   0x7   : > { %p229_p4 = scmp.lt.s32.totalorder (!%p196_p2), %s1702_s21, 127  ;;  %p1705_p5 = scmp.ne.s32.totalorder (!%p196_p2), %s2246_s19, 0 }
   0xd   : > { %s2555_s20 = smov (!%p224_p3, %s1701_s20), 7  ;;  %s2557_s21 = smov (!%p229_p4, %s1702_s21), 127 }
   0xe   : > { %s226_s24 = scalar_lea.vmem %s2548_s0, %s2555_s20  ;;  %s1873_s25 = sshll.u32 %s2557_s21, 4  ;;  %v2206_v0 = vmov (!%p1705_p5), 0.0  }
   0xf   : > { %s2261_s28 = scalar_lea.vmem %s2549_s1, %s1873_s25  ;;  %239 = sbr.rel (%p1705_p5) target bundleno = 22 (0x16), region = 44  ;;  %240 = vst [vmem:[#allocation2] sm:$0xff] (!%p1705_p5), %v2206_v0 }
  0x16 PF: > { %v1944_v1 = vld [vmem:[%s2261_s28 + $0x4] ss:$16 sps:$4 sm:$0xff]   ;;  %v1946_v2 = vld [vmem:[%s2261_s28 + $0xc] ss:$16 sps:$4 sm:$0xff]   ;;  %v1948_v3 = vld [vmem:[%s2261_s28] ss:$16 sps:$4 sm:$0xff]   ;;  %v383_v41 = vlaneseq }
  0x17   : > { %1040 = vmatprep.subr.bf16.mxu0 %v1944_v1  ;;  %v1949_v4 = vld [vmem:[%s2261_s28 + $0x8] ss:$16 sps:$4 sm:$0xff]   ;;  %1122 = vmatprep.subr.bf16.mxu1 %v1946_v2  ;;  %v1950_v5 = vld [vmem:[%s2261_s28 + $0x24] ss:$16 sps:$4 sm:$0xff]   ;;  %v1952_v6 = vld [vmem:[%s2261_s28 + $0x2c] ss:$16 sps:$4 sm:$0xff]  }
  0x18   : > { %1041 = vmatpush1.bf16.msra.mxu0 %v1948_v3  ;;  %1123 = vmatpush1.bf16.msra.mxu1 %v1949_v4  ;;  %v1954_v7 = vld [vmem:[%s2261_s28 + $0x20] ss:$16 sps:$4 sm:$0xff]   ;;  %v1955_v8 = vld [vmem:[%s2261_s28 + $0x28] ss:$16 sps:$4 sm:$0xff]   ;;  %v1956_v9 = vld [vmem:[%s2261_s28 + $0x44] ss:$16 sps:$4 sm:$0xff]  }
  0x19   : > { %1042 = vmatprep.subr.bf16.mxu0 %v1950_v5  ;;  %1124 = vmatprep.subr.bf16.mxu1 %v1952_v6  ;;  %v1958_v10 = vld [vmem:[%s2261_s28 + $0x4c] ss:$16 sps:$4 sm:$0xff]   ;;  %v1960_v11 = vld [vmem:[%s2261_s28 + $0x40] ss:$16 sps:$4 sm:$0xff]   ;;  %v1961_v12 = vld [vmem:[%s2261_s28 + $0x48] ss:$16 sps:$4 sm:$0xff]  }
  0x1a   : > { %v1962_v13 = vld [vmem:[%s2261_s28 + $0x64] ss:$16 sps:$4 sm:$0xff]   ;;  %v1964_v14 = vld [vmem:[%s2261_s28 + $0x6c] ss:$16 sps:$4 sm:$0xff]   ;;  %v1966_v15 = vld [vmem:[%s2261_s28 + $0x60] ss:$16 sps:$4 sm:$0xff]  }
  0x1b   : > { %v1967_v16 = vld [vmem:[%s2261_s28 + $0x68] ss:$16 sps:$4 sm:$0xff]   ;;  %v1968_v17 = vld [vmem:[%s2261_s28 + $0x84] ss:$16 sps:$4 sm:$0xff]   ;;  %v1970_v18 = vld [vmem:[%s2261_s28 + $0x8c] ss:$16 sps:$4 sm:$0xff]  }
  0x1c   : > { %1043 = vmatpush1.bf16.msra.mxu0 %v1954_v7  ;;  %1125 = vmatpush1.bf16.msra.mxu1 %v1955_v8  ;;  %v1972_v19 = vld [vmem:[%s2261_s28 + $0x80] ss:$16 sps:$4 sm:$0xff]   ;;  %v1973_v20 = vld [vmem:[%s2261_s28 + $0x88] ss:$16 sps:$4 sm:$0xff]   ;;  %v1974_v21 = vld [vmem:[%s2261_s28 + $0xa4] ss:$16 sps:$4 sm:$0xff]  }
  0x1d   : > { %1044 = vmatprep.subr.bf16.mxu0 %v1956_v9  ;;  %1126 = vmatprep.subr.bf16.mxu1 %v1958_v10  ;;  %v1976_v22 = vld [vmem:[%s2261_s28 + $0xac] ss:$16 sps:$4 sm:$0xff]   ;;  %v1978_v23 = vld [vmem:[%s2261_s28 + $0xa0] ss:$16 sps:$4 sm:$0xff]   ;;  %v1979_v24 = vld [vmem:[%s2261_s28 + $0xa8] ss:$16 sps:$4 sm:$0xff]  }
  0x1e   : > { %v1980_v25 = vld [vmem:[%s2261_s28 + $0xc4] ss:$16 sps:$4 sm:$0xff]   ;;  %v1982_v26 = vld [vmem:[%s2261_s28 + $0xcc] ss:$16 sps:$4 sm:$0xff]   ;;  %v1984_v27 = vld [vmem:[%s2261_s28 + $0xc0] ss:$16 sps:$4 sm:$0xff]  }
  0x1f   : > { %v1985_v28 = vld [vmem:[%s2261_s28 + $0xc8] ss:$16 sps:$4 sm:$0xff]   ;;  %v1986_v29 = vld [vmem:[%s2261_s28 + $0xe4] ss:$16 sps:$4 sm:$0xff]   ;;  %v1988_v30 = vld [vmem:[%s2261_s28 + $0xec] ss:$16 sps:$4 sm:$0xff]  }
  0x20   : > { %1045 = vmatpush1.bf16.msra.mxu0 %v1960_v11  ;;  %1127 = vmatpush1.bf16.msra.mxu1 %v1961_v12  ;;  %v1990_v31 = vld [vmem:[%s2261_s28 + $0xe0] ss:$16 sps:$4 sm:$0xff]   ;;  %v1991_v32 = vld [vmem:[%s2261_s28 + $0xe8] ss:$16 sps:$4 sm:$0xff]   ;;  %v1992_v33 = vld [vmem:[%s2261_s28 + $0x104] ss:$16 sps:$4 sm:$0xff]  }
  0x21   : > { %1046 = vmatprep.subr.bf16.mxu0 %v1962_v13  ;;  %1128 = vmatprep.subr.bf16.mxu1 %v1964_v14  ;;  %v1994_v34 = vld [vmem:[%s2261_s28 + $0x10c] ss:$16 sps:$4 sm:$0xff]   ;;  %v1996_v35 = vld [vmem:[%s2261_s28 + $0x100] ss:$16 sps:$4 sm:$0xff]   ;;  %v1997_v36 = vld [vmem:[%s2261_s28 + $0x108] ss:$16 sps:$4 sm:$0xff]  }
  0x22   : > { %v1998_v37 = vld [vmem:[%s2261_s28 + $0x124] ss:$16 sps:$4 sm:$0xff]   ;;  %v2000_v38 = vld [vmem:[%s2261_s28 + $0x12c] ss:$16 sps:$4 sm:$0xff]   ;;  %v2207_v39 = vmov 1966171168  }
  0x23   : > { %v381_v40 = vunpack.c.l.s4 %v2207_v39  ;;  %v2002_v42 = vld [vmem:[%s2261_s28 + $0x120] ss:$16 sps:$4 sm:$0xff]   ;;  %v2003_v43 = vld [vmem:[%s2261_s28 + $0x128] ss:$16 sps:$4 sm:$0xff]   ;;  %v2004_v44 = vld [vmem:[%s2261_s28 + $0x144] ss:$16 sps:$4 sm:$0xff]  }
  0x24   : > { %1047 = vmatpush1.bf16.msra.mxu0 %v1966_v15  ;;  %1129 = vmatpush1.bf16.msra.mxu1 %v1967_v16  ;;  %v2006_v45 = vld [vmem:[%s2261_s28 + $0x14c] ss:$16 sps:$4 sm:$0xff]   ;;  %v2306_v47 = vshrl.u32 %v383_v41, 7  ;;  %v2008_v48 = vld [vmem:[%s2261_s28 + $0x140] ss:$16 sps:$4 sm:$0xff]   ;;  %p1835_p6 = scmp.ne.s32.totalorder %s2246_s19, 1 }
  0x25   : > { %1048 = vmatprep.subr.bf16.mxu0 %v1968_v17  ;;  %1130 = vmatprep.subr.bf16.mxu1 %v1970_v18  ;;  %v382_v46 = vunpack.c.0.s8 %v381_v40  ;;  %v2009_v49 = vld [vmem:[%s2261_s28 + $0x148] ss:$16 sps:$4 sm:$0xff]   ;;  %v2010_v50 = vld [vmem:[%s2261_s28 + $0x164] ss:$16 sps:$4 sm:$0xff]   ;;  %v2012_v51 = vld [vmem:[%s2261_s28 + $0x16c] ss:$16 sps:$4 sm:$0xff]  }
  0x26   : > { %v1706_v53 = vld.sshfl [vmem:[%s226_s24] sm:$0x33 pattern:$0x75316420]  ;;  %v2015_v55 = vld [vmem:[%s2261_s28 + $0x168] ss:$16 sps:$4 sm:$0xff]  }
  0x27   : > { %v385_v52 = vsub.s32 %v382_v46, %v2306_v47  ;;  %v2014_v54 = vld [vmem:[%s2261_s28 + $0x160] ss:$16 sps:$4 sm:$0xff]   ;;  %v379_v56 = vcombine.high %v1706_v53, %v1706_v53  ;;  %v2016_v57 = vld [vmem:[%s2261_s28 + $0x184] ss:$16 sps:$4 sm:$0xff]   ;;  %v2018_v58 = vld [vmem:[%s2261_s28 + $0x18c] ss:$16 sps:$4 sm:$0xff]  }
  0x28   : > { %1049 = vmatpush1.bf16.msra.mxu0 %v1972_v19  ;;  %1131 = vmatpush1.bf16.msra.mxu1 %v1973_v20  ;;  %v2020_v60 = vld [vmem:[%s2261_s28 + $0x180] ss:$16 sps:$4 sm:$0xff]   ;;  %v2021_v61 = vld [vmem:[%s2261_s28 + $0x188] ss:$16 sps:$4 sm:$0xff]   ;;  %v2022_v62 = vld [vmem:[%s2261_s28 + $0x1a4] ss:$16 sps:$4 sm:$0xff]  }
  0x29   : > { %1050 = vmatprep.subr.bf16.mxu0 %v1974_v21  ;;  %1132 = vmatprep.subr.bf16.mxu1 %v1976_v22  ;;  %v393_v59 = vrot.slane %v379_v56, %v385_v52  ;;  %v2024_v63 = vld [vmem:[%s2261_s28 + $0x1ac] ss:$16 sps:$4 sm:$0xff]   ;;  %v2026_v0 = vld [vmem:[%s2261_s28 + $0x1a0] ss:$16 sps:$4 sm:$0xff]   ;;  %v2027_v1 = vld [vmem:[%s2261_s28 + $0x1a8] ss:$16 sps:$4 sm:$0xff]   ;;  %v2339_v13 = vrot.slane %v1706_v53, %v385_v52 }
  0x2a   : > { %v2028_v2 = vld [vmem:[%s2261_s28 + $0x1c4] ss:$16 sps:$4 sm:$0xff]   ;;  %v2030_v3 = vld [vmem:[%s2261_s28 + $0x1cc] ss:$16 sps:$4 sm:$0xff]   ;;  %v2032_v4 = vld [vmem:[%s2261_s28 + $0x1c0] ss:$16 sps:$4 sm:$0xff]  }
  0x2b   : > { %1072 = vmatprep.mubr.bf16.mxu0 %v393_v59  ;;  %1154 = vmatprep.mubr.bf16.mxu1 %v393_v59  ;;  %v2033_v5 = vld [vmem:[%s2261_s28 + $0x1c8] ss:$16 sps:$4 sm:$0xff]   ;;  %v2034_v6 = vld [vmem:[%s2261_s28 + $0x1e4] ss:$16 sps:$4 sm:$0xff]   ;;  %v2036_v7 = vld [vmem:[%s2261_s28 + $0x1ec] ss:$16 sps:$4 sm:$0xff]   ;;  %v395_v17 = vcombine.high %v393_v59, %v393_v59 }
  0x2c   : > { %1051 = vmatpush1.bf16.msra.mxu0 %v1978_v23  ;;  %1133 = vmatpush1.bf16.msra.mxu1 %v1979_v24  ;;  %v2038_v8 = vld [vmem:[%s2261_s28 + $0x1e0] ss:$16 sps:$4 sm:$0xff]   ;;  %v2039_v9 = vld [vmem:[%s2261_s28 + $0x1e8] ss:$16 sps:$4 sm:$0xff]   ;;  %v2042_v10 = vld [vmem:[%s2261_s28 + $0x204] ss:$16 sps:$4 sm:$0xff]  }
  0x2d   : > { %1052 = vmatprep.subr.bf16.mxu0 %v1980_v25  ;;  %1134 = vmatprep.subr.bf16.mxu1 %v1982_v26  ;;  %v2045_v11 = vld [vmem:[%s2261_s28 + $0x20c] ss:$16 sps:$4 sm:$0xff]   ;;  %v2040_v12 = vld [vmem:[%s2261_s28 + $0x200] ss:$16 sps:$4 sm:$0xff]   ;;  %v2043_v14 = vld [vmem:[%s2261_s28 + $0x208] ss:$16 sps:$4 sm:$0xff]  }
  0x2e   : > { %v2048_v15 = vld [vmem:[%s2261_s28 + $0x224] ss:$16 sps:$4 sm:$0xff]   ;;  %v2051_v16 = vld [vmem:[%s2261_s28 + $0x22c] ss:$16 sps:$4 sm:$0xff]   ;;  %v2046_v18 = vld [vmem:[%s2261_s28 + $0x220] ss:$16 sps:$4 sm:$0xff]  }
  0x2f   : > { %v2049_v19 = vld [vmem:[%s2261_s28 + $0x228] ss:$16 sps:$4 sm:$0xff]   ;;  %v2054_v20 = vld [vmem:[%s2261_s28 + $0x244] ss:$16 sps:$4 sm:$0xff]   ;;  %v2057_v21 = vld [vmem:[%s2261_s28 + $0x24c] ss:$16 sps:$4 sm:$0xff]  }
  0x30   : > { %1053 = vmatpush1.bf16.msra.mxu0 %v1984_v27  ;;  %1135 = vmatpush1.bf16.msra.mxu1 %v1985_v28  ;;  %v2052_v22 = vld [vmem:[%s2261_s28 + $0x240] ss:$16 sps:$4 sm:$0xff]   ;;  %v2055_v23 = vld [vmem:[%s2261_s28 + $0x248] ss:$16 sps:$4 sm:$0xff]   ;;  %v2060_v24 = vld [vmem:[%s2261_s28 + $0x264] ss:$16 sps:$4 sm:$0xff]  }
  0x31   : > { %1054 = vmatprep.subr.bf16.mxu0 %v1986_v29  ;;  %1136 = vmatprep.subr.bf16.mxu1 %v1988_v30  ;;  %v2063_v25 = vld [vmem:[%s2261_s28 + $0x26c] ss:$16 sps:$4 sm:$0xff]   ;;  %v2058_v26 = vld [vmem:[%s2261_s28 + $0x260] ss:$16 sps:$4 sm:$0xff]   ;;  %v2061_v27 = vld [vmem:[%s2261_s28 + $0x268] ss:$16 sps:$4 sm:$0xff]  }
  0x32   : > { %v2066_v28 = vld [vmem:[%s2261_s28 + $0x284] ss:$16 sps:$4 sm:$0xff]   ;;  %v2069_v29 = vld [vmem:[%s2261_s28 + $0x28c] ss:$16 sps:$4 sm:$0xff]   ;;  %v2064_v30 = vld [vmem:[%s2261_s28 + $0x280] ss:$16 sps:$4 sm:$0xff]  }
  0x33   : > { %v2079_v39 = vld [vmem:[%s2261_s28 + $0x2c8] ss:$16 sps:$4 sm:$0xff]   ;;  %v2084_v40 = vld [vmem:[%s2261_s28 + $0x2e4] ss:$16 sps:$4 sm:$0xff]   ;;  %v2087_v41 = vld [vmem:[%s2261_s28 + $0x2ec] ss:$16 sps:$4 sm:$0xff]  }
  0x34   : > { %1055 = vmatpush1.bf16.msra.mxu0 %v1990_v31  ;;  %1137 = vmatpush1.bf16.msra.mxu1 %v1991_v32  ;;  %v2067_v31 = vld [vmem:[%s2261_s28 + $0x288] ss:$16 sps:$4 sm:$0xff]   ;;  %v2072_v32 = vld [vmem:[%s2261_s28 + $0x2a4] ss:$16 sps:$4 sm:$0xff]   ;;  %v2088_v46 = vld [vmem:[%s2261_s28 + $0x300] ss:$16 sps:$4 sm:$0xff]  }
  0x35   : > { %1056 = vmatprep.subr.bf16.mxu0 %v1992_v33  ;;  %1138 = vmatprep.subr.bf16.mxu1 %v1994_v34  ;;  %v2075_v33 = vld [vmem:[%s2261_s28 + $0x2ac] ss:$16 sps:$4 sm:$0xff]   ;;  %v2070_v34 = vld [vmem:[%s2261_s28 + $0x2a0] ss:$16 sps:$4 sm:$0xff]   ;;  %v2097_v52 = vld [vmem:[%s2261_s28 + $0x328] ss:$16 sps:$4 sm:$0xff]  }
  0x36   : > { %v2102_v53 = vld [vmem:[%s2261_s28 + $0x344] ss:$16 sps:$4 sm:$0xff]   ;;  %v2103_v56 = vld [vmem:[%s2261_s28 + $0x348] ss:$16 sps:$4 sm:$0xff]   ;;  %v2106_v59 = vld [vmem:[%s2261_s28 + $0x360] ss:$16 sps:$4 sm:$0xff]  }
  0x37   : > { %vm1640_vm0 = vcmask (!%p1835_p6), 50176  }
  0x38   : > { %1057 = vmatpush1.bf16.msra.mxu0 %v1996_v35  ;;  %1139 = vmatpush1.bf16.msra.mxu1 %v1997_v36  ;;  %v2073_v35 = vld [vmem:[%s2261_s28 + $0x2a8] ss:$16 sps:$4 sm:$0xff]   ;;  %v2078_v36 = vld [vmem:[%s2261_s28 + $0x2c4] ss:$16 sps:$4 sm:$0xff]  }
  0x39   : > { %1058 = vmatprep.subr.bf16.mxu0 %v1998_v37  ;;  %1140 = vmatprep.subr.bf16.mxu1 %v2000_v38  ;;  %v2081_v37 = vld [vmem:[%s2261_s28 + $0x2cc] ss:$16 sps:$4 sm:$0xff]   ;;  %v2076_v38 = vld [vmem:[%s2261_s28 + $0x2c0] ss:$16 sps:$4 sm:$0xff]  }
  0x3c   : > { %1059 = vmatpush1.bf16.msra.mxu0 %v2002_v42  ;;  %1141 = vmatpush1.bf16.msra.mxu1 %v2003_v43  ;;  %v2082_v42 = vld [vmem:[%s2261_s28 + $0x2e0] ss:$16 sps:$4 sm:$0xff]   ;;  %v2085_v43 = vld [vmem:[%s2261_s28 + $0x2e8] ss:$16 sps:$4 sm:$0xff]  }
  0x3d   : > { %1060 = vmatprep.subr.bf16.mxu0 %v2004_v44  ;;  %1142 = vmatprep.subr.bf16.mxu1 %v2006_v45  ;;  %v2090_v44 = vld [vmem:[%s2261_s28 + $0x304] ss:$16 sps:$4 sm:$0xff]   ;;  %v2093_v45 = vld [vmem:[%s2261_s28 + $0x30c] ss:$16 sps:$4 sm:$0xff]  }
  0x40   : > { %1061 = vmatpush1.bf16.msra.mxu0 %v2008_v48  ;;  %1143 = vmatpush1.bf16.msra.mxu1 %v2009_v49  ;;  %v2091_v48 = vld [vmem:[%s2261_s28 + $0x308] ss:$16 sps:$4 sm:$0xff]   ;;  %v2096_v49 = vld [vmem:[%s2261_s28 + $0x324] ss:$16 sps:$4 sm:$0xff]  }
  0x41   : > { %1062 = vmatprep.subr.bf16.mxu0 %v2010_v50  ;;  %1144 = vmatprep.subr.bf16.mxu1 %v2012_v51  ;;  %v2099_v50 = vld [vmem:[%s2261_s28 + $0x32c] ss:$16 sps:$4 sm:$0xff]   ;;  %v2094_v51 = vld [vmem:[%s2261_s28 + $0x320] ss:$16 sps:$4 sm:$0xff]  }
  0x44   : > { %1063 = vmatpush1.bf16.msra.mxu0 %v2014_v54  ;;  %1145 = vmatpush1.bf16.msra.mxu1 %v2015_v55  ;;  %v2105_v54 = vld [vmem:[%s2261_s28 + $0x34c] ss:$16 sps:$4 sm:$0xff]   ;;  %v2100_v55 = vld [vmem:[%s2261_s28 + $0x340] ss:$16 sps:$4 sm:$0xff]  }
  0x45   : > { %1064 = vmatprep.subr.bf16.mxu0 %v2016_v57  ;;  %1146 = vmatprep.subr.bf16.mxu1 %v2018_v58  ;;  %v2108_v57 = vld [vmem:[%s2261_s28 + $0x364] ss:$16 sps:$4 sm:$0xff]   ;;  %v2111_v58 = vld [vmem:[%s2261_s28 + $0x36c] ss:$16 sps:$4 sm:$0xff]  }
  0x48   : > { %1065 = vmatpush1.bf16.msra.mxu0 %v2020_v60  ;;  %1147 = vmatpush1.bf16.msra.mxu1 %v2021_v61  ;;  %v2109_v60 = vld [vmem:[%s2261_s28 + $0x368] ss:$16 sps:$4 sm:$0xff]   ;;  %v2114_v61 = vld [vmem:[%s2261_s28 + $0x384] ss:$16 sps:$4 sm:$0xff]  }
  0x49   : > { %1066 = vmatprep.subr.bf16.mxu0 %v2022_v62  ;;  %1148 = vmatprep.subr.bf16.mxu1 %v2024_v63  ;;  %v2117_v62 = vld [vmem:[%s2261_s28 + $0x38c] ss:$16 sps:$4 sm:$0xff]   ;;  %v2112_v63 = vld [vmem:[%s2261_s28 + $0x380] ss:$16 sps:$4 sm:$0xff]  }
  0x4c   : > { %1067 = vmatpush1.bf16.msra.mxu0 %v2026_v0  ;;  %1149 = vmatpush1.bf16.msra.mxu1 %v2027_v1  ;;  %v2115_v0 = vld [vmem:[%s2261_s28 + $0x388] ss:$16 sps:$4 sm:$0xff]   ;;  %v2120_v1 = vld [vmem:[%s2261_s28 + $0x3a4] ss:$16 sps:$4 sm:$0xff]  }
  0x4d   : > { %1068 = vmatprep.subr.bf16.mxu0 %v2028_v2  ;;  %1150 = vmatprep.subr.bf16.mxu1 %v2030_v3  ;;  %v2123_v2 = vld [vmem:[%s2261_s28 + $0x3ac] ss:$16 sps:$4 sm:$0xff]   ;;  %v2118_v3 = vld [vmem:[%s2261_s28 + $0x3a0] ss:$16 sps:$4 sm:$0xff]  }
  0x50   : > { %1069 = vmatpush1.bf16.msra.mxu0 %v2032_v4  ;;  %1151 = vmatpush1.bf16.msra.mxu1 %v2033_v5  ;;  %v2121_v4 = vld [vmem:[%s2261_s28 + $0x3a8] ss:$16 sps:$4 sm:$0xff]   ;;  %v2126_v5 = vld [vmem:[%s2261_s28 + $0x3c4] ss:$16 sps:$4 sm:$0xff]  }
  0x51   : > { %1070 = vmatprep.subr.bf16.mxu0 %v2034_v6  ;;  %1152 = vmatprep.subr.bf16.mxu1 %v2036_v7  ;;  %v2129_v6 = vld [vmem:[%s2261_s28 + $0x3cc] ss:$16 sps:$4 sm:$0xff]   ;;  %v2124_v7 = vld [vmem:[%s2261_s28 + $0x3c0] ss:$16 sps:$4 sm:$0xff]  }
  0x54   : > { %1071 = vmatpush1.bf16.msra.mxu0 %v2038_v8  ;;  %1153 = vmatpush1.bf16.msra.mxu1 %v2039_v9  ;;  %v2127_v8 = vld [vmem:[%s2261_s28 + $0x3c8] ss:$16 sps:$4 sm:$0xff]   ;;  %v2132_v9 = vld [vmem:[%s2261_s28 + $0x3e4] ss:$16 sps:$4 sm:$0xff]  }
  0x55   : > { %1081 = vmatprep.subr.bf16.mxu0 %v2042_v10  ;;  %1163 = vmatprep.subr.bf16.mxu1 %v2045_v11  ;;  %v2135_v10 = vld [vmem:[%s2261_s28 + $0x3ec] ss:$16 sps:$4 sm:$0xff]   ;;  %v2130_v11 = vld [vmem:[%s2261_s28 + $0x3e0] ss:$16 sps:$4 sm:$0xff]  }
  0x57   : > { %1073 = vmatmul.mubr.bf16.vlgmr.msra.gmra.mrb[0].mxu0 %v2339_v13  ;;  %1155 = vmatmul.mubr.bf16.vlgmr.msra.gmra.mrb[0].mxu1 %v2339_v13 }
  0x58   : > { %1082 = vmatpush1.bf16.msra.mxu0 %v2040_v12  ;;  %1164 = vmatpush1.bf16.msra.mxu1 %v2043_v14  ;;  %v2133_v12 = vld [vmem:[%s2261_s28 + $0x3e8] ss:$16 sps:$4 sm:$0xff]   ;;  %v394_v14 = vcombine.high %v2339_v13, %v2339_v13 }
  0x59   : > { %1083 = vmatprep.subr.bf16.mxu0 %v2048_v15  ;;  %1165 = vmatprep.subr.bf16.mxu1 %v2051_v16  ;;  %v2208_v15 = vmov 1983009808  }
  0x5a   : > { %1113 = vmatprep.mubr.bf16.mxu0 %v395_v17  ;;  %1195 = vmatprep.mubr.bf16.mxu1 %v395_v17  ;;  %v1211_v16 = vunpack.c.l.s4 %v2208_v15 }
  0x5c   : > { %1084 = vmatpush1.bf16.msra.mxu0 %v2046_v18  ;;  %1166 = vmatpush1.bf16.msra.mxu1 %v2049_v19  ;;  %v1212_v17 = vunpack.c.0.s8 %v1211_v16 }
  0x5d   : > { %1085 = vmatprep.subr.bf16.mxu0 %v2054_v20  ;;  %1167 = vmatprep.subr.bf16.mxu1 %v2057_v21 }
  0x5e   : > { %v2407_v20 = vsub.s32 %v1212_v17, %v2306_v47 }
  0x60   : > { %1086 = vmatpush1.bf16.msra.mxu0 %v2052_v22  ;;  %1168 = vmatpush1.bf16.msra.mxu1 %v2055_v23 }
  0x61   : > { %1087 = vmatprep.subr.bf16.mxu0 %v2060_v24  ;;  %1169 = vmatprep.subr.bf16.mxu1 %v2063_v25 }
  0x64   : > { %1088 = vmatpush1.bf16.msra.mxu0 %v2058_v26  ;;  %1170 = vmatpush1.bf16.msra.mxu1 %v2061_v27 }
  0x65   : > { %1089 = vmatprep.subr.bf16.mxu0 %v2066_v28  ;;  %1171 = vmatprep.subr.bf16.mxu1 %v2069_v29 }
  0x68   : > { %1090 = vmatpush1.bf16.msra.mxu0 %v2064_v30  ;;  %1172 = vmatpush1.bf16.msra.mxu1 %v2067_v31  ;;  %v241_v30 = vld [vmem:[#allocation2] sm:$0xff] }
  0x69   : > { %1091 = vmatprep.subr.bf16.mxu0 %v2072_v32  ;;  %1173 = vmatprep.subr.bf16.mxu1 %v2075_v33  ;;  %v2136_v33 = vld [vmem:[%s2551_s3 + $0x40] sm:$0xff] (!%p1835_p6)  }
  0x6c   : > { %1092 = vmatpush1.bf16.msra.mxu0 %v2070_v34  ;;  %1174 = vmatpush1.bf16.msra.mxu1 %v2073_v35  ;;  %v2137_v34 = vld [vmem:[%s2551_s3 + $0xc0] sm:$0xff] (!%p1835_p6)  }
  0x6d   : > { %1093 = vmatprep.subr.bf16.mxu0 %v2078_v36  ;;  %1175 = vmatprep.subr.bf16.mxu1 %v2081_v37  ;;  %v2138_v35 = vld [vmem:[%s2551_s3] sm:$0xff] (!%p1835_p6)   ;;  %v2140_v37 = vld [vmem:[%s2551_s3 + $0x48] sm:$0xff] (!%p1835_p6)  }
  0x6e   : > { %v2139_v36 = vld [vmem:[%s2551_s3 + $0x80] sm:$0xff] (!%p1835_p6)  }
  0x70   : > { %1094 = vmatpush1.bf16.msra.mxu0 %v2076_v38  ;;  %1176 = vmatpush1.bf16.msra.mxu1 %v2079_v39  ;;  %v2141_v38 = vld [vmem:[%s2551_s3 + $0xc8] sm:$0xff] (!%p1835_p6)  }
  0x71   : > { %1095 = vmatprep.subr.bf16.mxu0 %v2084_v40  ;;  %1177 = vmatprep.subr.bf16.mxu1 %v2087_v41  ;;  %v2142_v39 = vld [vmem:[%s2551_s3 + $0x8] sm:$0xff] (!%p1835_p6)   ;;  %v2144_v41 = vld [vmem:[%s2551_s3 + $0x50] sm:$0xff] (!%p1835_p6)  }
  0x72   : > { %v2143_v40 = vld [vmem:[%s2551_s3 + $0x88] sm:$0xff] (!%p1835_p6)  }
  0x74   : > { %1096 = vmatpush1.bf16.msra.mxu0 %v2082_v42  ;;  %1178 = vmatpush1.bf16.msra.mxu1 %v2085_v43  ;;  %v2145_v42 = vld [vmem:[%s2551_s3 + $0xd0] sm:$0xff] (!%p1835_p6)  }
  0x75   : > { %1097 = vmatprep.subr.bf16.mxu0 %v2090_v44  ;;  %1179 = vmatprep.subr.bf16.mxu1 %v2093_v45  ;;  %v2146_v43 = vld [vmem:[%s2551_s3 + $0x10] sm:$0xff] (!%p1835_p6)   ;;  %v2148_v45 = vld [vmem:[%s2551_s3 + $0x58] sm:$0xff] (!%p1835_p6)  }
  0x76   : > { %v2147_v44 = vld [vmem:[%s2551_s3 + $0x90] sm:$0xff] (!%p1835_p6)  }
  0x78   : > { %1098 = vmatpush1.bf16.msra.mxu0 %v2088_v46  ;;  %1180 = vmatpush1.bf16.msra.mxu1 %v2091_v48  ;;  %v2149_v46 = vld [vmem:[%s2551_s3 + $0xd8] sm:$0xff] (!%p1835_p6)  }
  0x79   : > { %1099 = vmatprep.subr.bf16.mxu0 %v2096_v49  ;;  %1181 = vmatprep.subr.bf16.mxu1 %v2099_v50  ;;  %v2150_v48 = vld [vmem:[%s2551_s3 + $0x18] sm:$0xff] (!%p1835_p6)   ;;  %v2152_v50 = vld [vmem:[%s2551_s3 + $0x60] sm:$0xff] (!%p1835_p6)  }
  0x7a   : > { %v2151_v49 = vld [vmem:[%s2551_s3 + $0x98] sm:$0xff] (!%p1835_p6)  }
  0x7c   : > { %1100 = vmatpush1.bf16.msra.mxu0 %v2094_v51  ;;  %1182 = vmatpush1.bf16.msra.mxu1 %v2097_v52  ;;  %v2153_v51 = vld [vmem:[%s2551_s3 + $0xe0] sm:$0xff] (!%p1835_p6)  }
  0x7d   : > { %1101 = vmatprep.subr.bf16.mxu0 %v2102_v53  ;;  %1183 = vmatprep.subr.bf16.mxu1 %v2105_v54  ;;  %v2154_v52 = vld [vmem:[%s2551_s3 + $0x20] sm:$0xff] (!%p1835_p6)   ;;  %v2156_v54 = vld [vmem:[%s2551_s3 + $0x68] sm:$0xff] (!%p1835_p6)  }
  0x7e   : > { %v2155_v53 = vld [vmem:[%s2551_s3 + $0xa0] sm:$0xff] (!%p1835_p6)  }
  0x80   : > { %1102 = vmatpush1.bf16.msra.mxu0 %v2100_v55  ;;  %1184 = vmatpush1.bf16.msra.mxu1 %v2103_v56  ;;  %v2157_v55 = vld [vmem:[%s2551_s3 + $0xe8] sm:$0xff] (!%p1835_p6)  }
  0x81   : > { %1103 = vmatprep.subr.bf16.mxu0 %v2108_v57  ;;  %1185 = vmatprep.subr.bf16.mxu1 %v2111_v58  ;;  %v2158_v56 = vld [vmem:[%s2551_s3 + $0x28] sm:$0xff] (!%p1835_p6)   ;;  %v2160_v58 = vld [vmem:[%s2551_s3 + $0x70] sm:$0xff] (!%p1835_p6)  }
  0x82   : > { %v2159_v57 = vld [vmem:[%s2551_s3 + $0xa8] sm:$0xff] (!%p1835_p6)  }
  0x84   : > { %1104 = vmatpush1.bf16.msra.mxu0 %v2106_v59  ;;  %1186 = vmatpush1.bf16.msra.mxu1 %v2109_v60  ;;  %v2161_v59 = vld [vmem:[%s2551_s3 + $0xf0] sm:$0xff] (!%p1835_p6)  }
  0x85   : > { %1105 = vmatprep.subr.bf16.mxu0 %v2114_v61  ;;  %1187 = vmatprep.subr.bf16.mxu1 %v2117_v62  ;;  %v2162_v60 = vld [vmem:[%s2551_s3 + $0x30] sm:$0xff] (!%p1835_p6)   ;;  %v1237_v61 = vsub.s32 (!%p1835_p6), 0, %v2306_v47 }
  0x86   : > { %v2163_v62 = vld [vmem:[%s2551_s3 + $0xb0] sm:$0xff] (!%p1835_p6)  }
  0x88   : > { %1106 = vmatpush1.bf16.msra.mxu0 %v2112_v63  ;;  %1188 = vmatpush1.bf16.msra.mxu1 %v2115_v0  ;;  %v1241_v63 = vsub.s32 (!%p1835_p6), 1, %v2306_v47  ;;  %v2164_v0 = vld [vmem:[%s2551_s3 + $0x78] sm:$0xff] (!%p1835_p6)  }
  0x89   : > { %1107 = vmatprep.subr.bf16.mxu0 %v2120_v1  ;;  %1189 = vmatprep.subr.bf16.mxu1 %v2123_v2  ;;  %v1245_v1 = vsub.s32 (!%p1835_p6), 2, %v2306_v47  ;;  %v2165_v2 = vld [vmem:[%s2551_s3 + $0xf8] sm:$0xff] (!%p1835_p6)  }
  0x8c   : > { %1108 = vmatpush1.bf16.msra.mxu0 %v2118_v3  ;;  %1190 = vmatpush1.bf16.msra.mxu1 %v2121_v4  ;;  %v1249_v3 = vsub.s32 (!%p1835_p6), 3, %v2306_v47  ;;  %v2166_v4 = vld [vmem:[%s2551_s3 + $0x38] sm:$0xff] (!%p1835_p6)  }
  0x8d   : > { %1109 = vmatprep.subr.bf16.mxu0 %v2126_v5  ;;  %1191 = vmatprep.subr.bf16.mxu1 %v2129_v6  ;;  %v2167_v5 = vld [vmem:[%s2551_s3 + $0xb8] sm:$0xff] (!%p1835_p6)   ;;  %v1233_v6 = vld [vmem:[%s2550_s2] sm:$0xf] (!%p1835_p6) }
  0x8e   : > { %v1250_v47 = vrot.slane (!%p1835_p6), %v1233_v6, %v1249_v3 }
  0x90   : > { %1110 = vmatpush1.bf16.msra.mxu0 %v2124_v7  ;;  %1192 = vmatpush1.bf16.msra.mxu1 %v2127_v8  ;;  %v1238_v7 = vrot.slane (!%p1835_p6), %v1233_v6, %v1237_v61  ;;  %v1242_v8 = vrot.slane (!%p1835_p6), %v1233_v6, %v1241_v63 }
  0x91   : > { %1111 = vmatprep.subr.bf16.mxu0 %v2132_v9  ;;  %1193 = vmatprep.subr.bf16.mxu1 %v2135_v10  ;;  %v1246_v9 = vrot.slane (!%p1835_p6), %v1233_v6, %v1245_v1 }
  0x92   : > { %v1251_v10 = vcombine.low (!%p1835_p6), %v1238_v7, %v1242_v8 }
  0x94   : > { %1112 = vmatpush1.bf16.msra.mxu0 %v2130_v11  ;;  %1194 = vmatpush1.bf16.msra.mxu1 %v2133_v12  ;;  %v1252_v11 = vcombine.low (!%p1835_p6), %v1246_v9, %v1250_v47  ;;  %v1259_v12 = vrot.slane (!%p1835_p6), %v1251_v10, %v2407_v20 }
  0x95   : > { %1874 = vmatprep.subr.bf16.mxu0 (!%p1835_p6), %v2136_v33  ;;  %1896 = vmatprep.subr.bf16.mxu1 (!%p1835_p6), %v2137_v34 }
  0x97   : > { %1114 = vmatmul.mubr.bf16.vlgmr.msra.gmra.mrb[0].mxu0 %v394_v14  ;;  %1196 = vmatmul.mubr.bf16.vlgmr.msra.gmra.mrb[0].mxu1 %v394_v14  ;;  %v1266_v14 = vrot.slane (!%p1835_p6), %v1252_v11, %v2407_v20 }
  0x98   : > { %1875 = vmatpush3.bf16.msra.mxu0 (!%p1835_p6), %v2138_v35  ;;  %1897 = vmatpush3.bf16.msra.mxu1 (!%p1835_p6), %v2139_v36 }
  0x99   : > { %1876 = vmatprep.subr.bf16.mxu0 (!%p1835_p6), %v2140_v37  ;;  %1898 = vmatprep.subr.bf16.mxu1 (!%p1835_p6), %v2141_v38  ;;  %v1267_v16 = vcombine.low (!%p1835_p6), %v1259_v12, %v1266_v14 }
  0x9c   : > { %1877 = vmatpush3.bf16.msra.mxu0 (!%p1835_p6), %v2142_v39  ;;  %1899 = vmatpush3.bf16.msra.mxu1 (!%p1835_p6), %v2143_v40 }
  0x9d   : > { %1878 = vmatprep.subr.bf16.mxu0 (!%p1835_p6), %v2144_v41  ;;  %1900 = vmatprep.subr.bf16.mxu1 (!%p1835_p6), %v2145_v42 }
  0xa0   : > { %1879 = vmatpush3.bf16.msra.mxu0 (!%p1835_p6), %v2146_v43  ;;  %1901 = vmatpush3.bf16.msra.mxu1 (!%p1835_p6), %v2147_v44 }
  0xa1   : > { %1880 = vmatprep.subr.bf16.mxu0 (!%p1835_p6), %v2148_v45  ;;  %1902 = vmatprep.subr.bf16.mxu1 (!%p1835_p6), %v2149_v46 }
  0xa4   : > { %1881 = vmatpush3.bf16.msra.mxu0 (!%p1835_p6), %v2150_v48  ;;  %1903 = vmatpush3.bf16.msra.mxu1 (!%p1835_p6), %v2151_v49 }
  0xa5   : > { %1882 = vmatprep.subr.bf16.mxu0 (!%p1835_p6), %v2152_v50  ;;  %1904 = vmatprep.subr.bf16.mxu1 (!%p1835_p6), %v2153_v51 }
  0xa8   : > { %1883 = vmatpush3.bf16.msra.mxu0 (!%p1835_p6), %v2154_v52  ;;  %1905 = vmatpush3.bf16.msra.mxu1 (!%p1835_p6), %v2155_v53 }
  0xa9   : > { %1884 = vmatprep.subr.bf16.mxu0 (!%p1835_p6), %v2156_v54  ;;  %1906 = vmatprep.subr.bf16.mxu1 (!%p1835_p6), %v2157_v55 }
  0xac   : > { %1885 = vmatpush3.bf16.msra.mxu0 (!%p1835_p6), %v2158_v56  ;;  %1907 = vmatpush3.bf16.msra.mxu1 (!%p1835_p6), %v2159_v57 }
  0xad   : > { %1886 = vmatprep.subr.bf16.mxu0 (!%p1835_p6), %v2160_v58  ;;  %1908 = vmatprep.subr.bf16.mxu1 (!%p1835_p6), %v2161_v59 }
  0xb0   : > { %1887 = vmatpush3.bf16.msra.mxu0 (!%p1835_p6), %v2162_v60  ;;  %1909 = vmatpush3.bf16.msra.mxu1 (!%p1835_p6), %v2163_v62 }
  0xb1   : > { %1888 = vmatprep.subr.bf16.mxu0 (!%p1835_p6), %v2164_v0  ;;  %1910 = vmatprep.subr.bf16.mxu1 (!%p1835_p6), %v2165_v2 }
  0xb4   : > { %1889 = vmatpush3.bf16.msra.mxu0 (!%p1835_p6), %v2166_v4  ;;  %1911 = vmatpush3.bf16.msra.mxu1 (!%p1835_p6), %v2167_v5 }
 0x16a   : > { %v1115_v18 = vpop.f32.mrb[0].mxu0  ;;  %v1197_v19 = vpop.f32.mrb[0].mxu1 }
 0x16b   : > { %v1117_v21 = vpop.f32.mrb[1].mxu0  ;;  %v1199_v22 = vpop.f32.mrb[1].mxu1 }
 0x16c   : > { %v1208_v23 = vcombine.low %v1115_v18, %v1117_v21  ;;  %v1209_v24 = vcombine.low %v1197_v19, %v1199_v22  ;;  %v1119_v25 = vpop.f32.mrb[2].mxu0  ;;  %v1201_v26 = vpop.f32.mrb[2].mxu1 }
 0x16d   : > { %v1120_v27 = vpop.f32.mrb[3].mxu0  ;;  %v1202_v13 = vpop.f32.mrb[3].mxu1 }
 0x16e   : > { %v1216_v28 = vrot.slane %v1208_v23, %v2407_v20  ;;  %v1223_v29 = vrot.slane %v1209_v24, %v2407_v20  ;;  %1231 = sbr.rel (%p1835_p6) target bundleno = 611 (0x263), region = 48 }
 0x170   : > { %v1224_v31 = vcombine.low %v1216_v28, %v1223_v29  ;;  %v1836_v29 = vld [vmem:[%s2552_s4] ss:$0 sm:$0xff] (!%p1835_p6) }
 0x172   : > { %v1226_v32 = vadd.f32 %v1224_v31, %v241_v30 }
 0x174   : > { %1227 = vst [vmem:[#allocation2] sm:$0xff] %v1226_v32 }
 0x17b   : > { %v1232_v15 = vld [vmem:[#allocation2] sm:$0xff] }
 0x17c   : > { %v1269_v17 = vadd.f32 %v1267_v16, %v1232_v15 }
 0x17e   : > { %v1270_v18 = vmax.f32 %v1269_v17, 0.0 }
 0x180   : > { %v1279_v19 = vrot.slane %v1270_v18, %v2407_v20  ;;  %v1272_v21 = vcombine.high %v1270_v18, %v1270_v18 }
 0x182   : > { %v1287_v22 = vcombine.high %v1279_v19, %v1279_v19  ;;  %v1286_v23 = vrot.slane %v1272_v21, %v2407_v20  ;;  %v1293_v24 = vpack.c.bf16 %v1279_v19, %v1279_v19 }
 0x184   : > { %v1294_v25 = vpack.c.bf16 %v1287_v22, %v1287_v22  ;;  %v1288_v26 = vcombine.high %v1286_v23, %v1286_v23  ;;  %v1295_v27 = vpack.c.bf16 %v1286_v23, %v1286_v23 }
 0x186   : > { %1592 = vmatprep.mubr.bf16.mxu0 %v1294_v25  ;;  %v1296_v13 = vpack.c.bf16 %v1288_v26, %v1288_v26 }
 0x187   : > { %1593 = vmatmul.mubr.bf16.vlgmr.msra.gmra.mrb[0].mxu0 %v1293_v24 }
 0x188   : > { %1632 = vmatprep.mubr.bf16.mxu1 %v1296_v13 }
 0x189   : > { %1633 = vmatmul.mubr.bf16.vlgmr.msra.gmra.mrb[0].mxu1 %v1295_v27 }
 0x25a   : > { %v1890_v28 = vpop.f32.mrb[0].mxu0 }
 0x25b   : > { %v1891_v30 = vpop.f32.mrb[1].mxu0 }
 0x25c   : > { %v1912_v31 = vpop.f32.mrb[0].mxu1  ;;  %v1892_v32 = vadd.f32 %v1891_v30, %v1890_v28  ;;  %v1893_v33 = vpop.f32.mrb[2].mxu0 }
 0x25d   : > { %v1913_v34 = vpop.f32.mrb[1].mxu1  ;;  %v1894_v20 = vpop.f32.mrb[3].mxu0 }
 0x25e   : > { %v1595_v35 = vadd.f32 %v1892_v32, %v1836_v29  ;;  %v1914_v36 = vadd.f32 %v1913_v34, %v1912_v31  ;;  %v1915_v37 = vpop.f32.mrb[2].mxu1 }
 0x25f   : > { %v1916_v38 = vpop.f32.mrb[3].mxu1 }
 0x260   : > { %v1635_v39 = vadd.f32 %v1914_v36, %v1595_v35 }
 0x262   : > { %1641 = vst.msk [vmem:[#allocation3] sm:$0x3] %vm1640_vm0, %v1635_v39 }
 0x263 PF: > { %p1930_p7 = scmp.eq.s32.totalorder %s2246_s19, 1  ;;  %s2209_s30 = smov [#allocation3]  }
 0x264   : > { %s1649_s6 = sshll.u32 %s2209_s30, 4  ;;  %s1650_s6 = int_to_ptr.vmem [resolvable:$true] %s1649_s6 }
 0x265   : > { %s2168_s7 = scalar_lea.vmem %s1650_s6, 32  ;;  %p2175_p11 = scmp.lt.s32.totalorder %s1650_s6, %s1650_s6 }
 0x266   : > { %p2169_p8 = scmp.ne.s32.totalorder %s1650_s6, %s2168_s7  ;;  %p2176_p12 = scmp.lt.s32.totalorder %s2168_s7, %s2168_s7 }
 0x268   : > { %p2170_p9 = pnand %p2169_p8, %p1930_p7  ;;  %p2177_p13 = por %p2176_p12, %p2175_p11 }
 0x26a   : > { %p2171_p10 = pneg %p2170_p9 }
 0x26c   : > { %p2178_p0 = pnand %p2177_p13, %p2171_p10 }
 0x26e   : > { %2181 = shalt.err (!%p2178_p0)
}
 0x26f   : > { %s2182_s10 = scalar_lea.hbm %s2553_s5, 32 }
 0x270   : > { %p2183_p1 = scmp.ne.s32.totalorder %s2553_s5, %s2182_s10  ;;  %p2188_p4 = scmp.lt.u32.totalorder %s2182_s10, %s2553_s5 }
 0x272   : > { %p2184_p2 = pnand %p2183_p1, %p1930_p7 }
 0x274   : > { %p2185_p3 = pneg %p2184_p2 }
 0x276   : > { %p2190_p5 = pnand %p2188_p4, %p2185_p3 }
 0x278   : > { %2193 = shalt.err (!%p2190_p5)
}
 0x279   : > { %1927 = dma.vmem_to_hbm [thread:$0]  (%p1930_p7), %s1650_s6, 32, %s2553_s5, [#allocation4]  }
 0x27a   : > { %2199 = dma.done.wait (%p1930_p7), [#allocation4], 32  }
 0x27b   : > { %2201 = vsyncadd (%p1930_p7), [#allocation4], 4294967264 }
 0x27c PF: > { %s16_s18 = sadd.s32 1, %s2204_s18  }
 0x27d   : > { %p13_p6 = scmp.ge.s32.totalorder %s16_s18, 4  }
 0x27f   :  { %15 = sbr.rel (!%p13_p6) target bundleno = 1 (0x1), region = 78 }
 0x286   :  { %1662 = vsyncpa [#allocation4], 1 }
 0x287   :  { %1664 = vsyncpa [#allocation4 + $0x1], 1 }

</bundles_post_ra>
